<compile_context>
chip_gen: v7x
topology: tpu7x:2x2x1
jax: 0.10.0
libtpu: 0.0.40
codegen_flags: <defaults>
</compile_context>

<pallas_src>
import functools

import numpy as np
import jax
import jax.numpy as jnp
from jax.experimental import pallas as pl
from jax.experimental.pallas import tpu as pltpu


# ----------------------------------------------------------------------------
# 1-D resampling operators (host-built, cached; exact torch semantics).
# ----------------------------------------------------------------------------
@functools.lru_cache(maxsize=None)
def _adaptive_avg_pool_1d(out_size: int, in_size: int):
    """1-D operator reproducing torch adaptive_avg_pool bins along one axis."""
    m = np.zeros((out_size, in_size), dtype=np.float32)
    for o in range(out_size):
        start = (o * in_size) // out_size
        end = -((-(o + 1) * in_size) // out_size)      # ceil((o+1)*in/out)
        m[o, start:end] = 1.0 / float(end - start)
    return m


@functools.lru_cache(maxsize=None)
def _bilinear_1d(out_size: int, in_size: int):
    """1-D operator reproducing torch F.interpolate(mode='bilinear',
    align_corners=False) along one axis (incl. edge clamping)."""
    m = np.zeros((out_size, in_size), dtype=np.float32)
    scale = in_size / out_size
    for o in range(out_size):
        src = max((o + 0.5) * scale - 0.5, 0.0)
        i0 = min(int(np.floor(src)), in_size - 1)
        i1 = min(i0 + 1, in_size - 1)
        f = src - float(i0)
        m[o, i0] += 1.0 - f
        m[o, i1] += f
    return m


# ----------------------------------------------------------------------------
# Pallas kernel: one grid step == one batch element.
# ----------------------------------------------------------------------------
def _make_kernel(c_l: int, c_m: int, c_s: int, c_n: int):
    def kernel(xl_ref, xm_ref, xs_ref, xn_ref,
               phl_ref, pwl_ref, phm_ref, pwm_ref, phn_ref, pwn_ref,
               out_ref):
        f32 = jnp.float32
        odt = out_ref.dtype

        def resample(x_ref, ph_ref, pwT_ref):
            # x: (C, Hin, Win); ph: (H, Hin); pwT: (Win, W)
            x = x_ref[...]
            if x.dtype != f32:
                x = x.astype(f32)
            c = x.shape[0]
            # Operators are tiny 1-D matrices; broadcasting them over channels
            # gives a standard channel-batched matmul (flash-attn style).
            ph = jnp.broadcast_to(ph_ref[...], (c,) + ph_ref.shape)
            pwT = jnp.broadcast_to(pwT_ref[...], (c,) + pwT_ref.shape)
            # batched (H, Hin) @ (Hin, Win) -> (C, H, Win)
            t = jax.lax.dot_general(ph, x, (((2,), (1,)), ((0,), (0,))),
                                    preferred_element_type=f32)
            # batched (H, Win) @ (Win, W) -> (C, H, W)
            return jax.lax.dot_general(t, pwT, (((2,), (1,)), ((0,), (0,))),
                                       preferred_element_type=f32)

        # Channel concat realized as static channel-slice stores into one block.
        o = 0
        out_ref[o:o + c_l] = resample(xl_ref, phl_ref, pwl_ref).astype(odt)
        o += c_l
        out_ref[o:o + c_m] = resample(xm_ref, phm_ref, pwm_ref).astype(odt)
        o += c_m
        out_ref[o:o + c_s] = xs_ref[...].astype(odt)
        o += c_s
        out_ref[o:o + c_n] = resample(xn_ref, phn_ref, pwn_ref).astype(odt)

    return kernel


# ----------------------------------------------------------------------------
# Wrapper (jitted; NCHW in, NCHW out, no edge transposes)
# ----------------------------------------------------------------------------
@jax.jit
def simfusion4_pallas(x_l, x_m, x_s, x_n):
    n, c_l, h_l, w_l = x_l.shape
    _, c_m, h_m, w_m = x_m.shape
    _, c_s, h, w = x_s.shape
    _, c_n, h_n, w_n = x_n.shape
    c_tot = c_l + c_m + c_s + c_n
    out_dtype = x_s.dtype

    # Tiny separable 1-D resample operators (exact torch semantics).
    ph_l = jnp.asarray(_adaptive_avg_pool_1d(h, h_l))        # (H, h_l)
    pw_l = jnp.asarray(_adaptive_avg_pool_1d(w, w_l).T)      # (w_l, W)
    ph_m = jnp.asarray(_adaptive_avg_pool_1d(h, h_m))
    pw_m = jnp.asarray(_adaptive_avg_pool_1d(w, w_m).T)
    ph_n = jnp.asarray(_bilinear_1d(h, h_n))
    pw_n = jnp.asarray(_bilinear_1d(w, w_n).T)

    # True cost: separable resamples + straight copies (helps XLA scheduling).
    flops = 2 * n * (c_l * (h * h_l * w_l + h * w_l * w)
                     + c_m * (h * h_m * w_m + h * w_m * w)
                     + c_n * (h * h_n * w_n + h * w_n * w))
    bytes_accessed = (sum(int(np.prod(a.shape)) * a.dtype.itemsize
                          for a in (x_l, x_m, x_s, x_n))
                      + n * c_tot * h * w * np.dtype(out_dtype).itemsize)
    cost = pl.CostEstimate(flops=flops, transcendentals=0,
                           bytes_accessed=bytes_accessed)

    def img_spec(c, hh, ww):
        return pl.BlockSpec((None, c, hh, ww), lambda b: (b, 0, 0, 0))

    def op_spec(rows, cols):
        return pl.BlockSpec((rows, cols), lambda b: (0, 0))

    return pl.pallas_call(
        _make_kernel(c_l, c_m, c_s, c_n),
        out_shape=jax.ShapeDtypeStruct((n, c_tot, h, w), out_dtype),
        grid=(n,),
        in_specs=[
            img_spec(c_l, h_l, w_l),
            img_spec(c_m, h_m, w_m),
            img_spec(c_s, h, w),
            img_spec(c_n, h_n, w_n),
            op_spec(h, h_l), op_spec(w_l, w),
            op_spec(h, h_m), op_spec(w_m, w),
            op_spec(h, h_n), op_spec(w_n, w),
        ],
        out_specs=pl.BlockSpec((None, c_tot, h, w), lambda b: (b, 0, 0, 0)),
        compiler_params=pltpu.CompilerParams(
            dimension_semantics=("parallel",)),
        cost_estimate=cost,
    )(x_l, x_m, x_s, x_n, ph_l, pw_l, ph_m, pw_m, ph_n, pw_n)


# ----------------------------------------------------------------------------
# Plain-JAX reference (same math, independent code path) for a sanity check.
# ----------------------------------------------------------------------------
def simfusion4_reference(x_l, x_m, x_s, x_n):
    _, _, h, w = x_s.shape
    f32 = jnp.float32

    def _apply(x, ph, pw):
        y = jnp.einsum('hk,nckw->nchw', jnp.asarray(ph), x.astype(f32))
        return jnp.einsum('nchw,vw->nchv', y, jnp.asarray(pw))

    xl = _apply(x_l, _adaptive_avg_pool_1d(h, x_l.shape[2]),
                _adaptive_avg_pool_1d(w, x_l.shape[3]))
    xm = _apply(x_m, _adaptive_avg_pool_1d(h, x_m.shape[2]),
                _adaptive_avg_pool_1d(w, x_m.shape[3]))
    xn = _apply(x_n, _bilinear_1d(h, x_n.shape[2]),
                _bilinear_1d(w, x_n.shape[3]))
    out = jnp.concatenate([xl, xm, x_s.astype(f32), xn], axis=1)
    return out.astype(x_s.dtype)


if __name__ == "__main__":
    # Shapes consistent with SimFusion_4in in the GD-neck:
    #   x_l: stride-4 map  (4x the target spatial size)  -> adaptive avg pool
    #   x_m: stride-8 map  (2x)                          -> adaptive avg pool
    #   x_s: stride-16 map (defines output H, W)         -> passthrough
    #   x_n: stride-32 map (H/2, W/2)                    -> 2x bilinear upsample
    N, H, W = 2, 16, 16
    key = jax.random.PRNGKey(0)
    kl, km, ks, kn = jax.random.split(key, 4)
    x_l = jax.random.normal(kl, (N, 4, 4 * H, 4 * W), jnp.float32)
    x_m = jax.random.normal(km, (N, 6, 2 * H, 2 * W), jnp.float32)
    x_s = jax.random.normal(ks, (N, 8, H, W), jnp.float32)
    x_n = jax.random.normal(kn, (N, 8, H // 2, W // 2), jnp.float32)

    out = jax.block_until_ready(simfusion4_pallas(x_l, x_m, x_s, x_n))
    assert out.shape == (N, 4 + 6 + 8 + 8, H, W), out.shape

    ref = jax.block_until_ready(simfusion4_reference(x_l, x_m, x_s, x_n))
    np.testing.assert_allclose(np.asarray(out), np.asarray(ref),
                               rtol=1e-4, atol=1e-4)
    print("KERNEL_OK")
</pallas_src>

<mosaic_0001>
module attributes {stable_mosaic.version = 11 : i64} {
  func.func @kernel(%arg0: i32, %arg1: memref<1x4x64x64xf32, #tpu.memory_space<vmem>>, %arg2: memref<1x6x32x32xf32, #tpu.memory_space<vmem>>, %arg3: memref<1x8x16x16xf32, #tpu.memory_space<vmem>>, %arg4: memref<1x8x8x8xf32, #tpu.memory_space<vmem>>, %arg5: memref<16x64xf32, #tpu.memory_space<vmem>>, %arg6: memref<64x16xf32, #tpu.memory_space<vmem>>, %arg7: memref<16x32xf32, #tpu.memory_space<vmem>>, %arg8: memref<32x16xf32, #tpu.memory_space<vmem>>, %arg9: memref<16x8xf32, #tpu.memory_space<vmem>>, %arg10: memref<8x16xf32, #tpu.memory_space<vmem>>, %arg11: memref<1x26x16x16xf32, #tpu.memory_space<vmem>>) attributes {dimension_semantics = [#tpu.dimension_semantics<parallel>], iteration_bounds = array<i64: 2>, scalar_prefetch = 0 : i64, scratch_operands = 0 : i64, tpu.core_type = #tpu.core_type<tc>, window_params = [{transform_indices = @transform_0, window_bounds = array<i64: 1, 4, 64, 64>}, {transform_indices = @transform_1, window_bounds = array<i64: 1, 6, 32, 32>}, {transform_indices = @transform_2, window_bounds = array<i64: 1, 8, 16, 16>}, {transform_indices = @transform_3, window_bounds = array<i64: 1, 8, 8, 8>}, {pipeline_mode = #tpu.pipeline_mode<synchronous>, transform_indices = @transform_4, window_bounds = array<i64: 16, 64>}, {pipeline_mode = #tpu.pipeline_mode<synchronous>, transform_indices = @transform_5, window_bounds = array<i64: 64, 16>}, {pipeline_mode = #tpu.pipeline_mode<synchronous>, transform_indices = @transform_6, window_bounds = array<i64: 16, 32>}, {pipeline_mode = #tpu.pipeline_mode<synchronous>, transform_indices = @transform_7, window_bounds = array<i64: 32, 16>}, {pipeline_mode = #tpu.pipeline_mode<synchronous>, transform_indices = @transform_8, window_bounds = array<i64: 16, 8>}, {pipeline_mode = #tpu.pipeline_mode<synchronous>, transform_indices = @transform_9, window_bounds = array<i64: 8, 16>}, {transform_indices = @transform_10, window_bounds = array<i64: 1, 26, 16, 16>}]} {
    %c0 = arith.constant 0 : index
    %c0_0 = arith.constant 0 : index
    %c0_1 = arith.constant 0 : index
    %c0_2 = arith.constant 0 : index
    %0 = vector.load %arg1[%c0, %c0_0, %c0_1, %c0_2] : memref<1x4x64x64xf32, #tpu.memory_space<vmem>>, vector<1x4x64x64xf32>
    %1 = vector.shape_cast %0 : vector<1x4x64x64xf32> to vector<4x64x64xf32>
    %c0_3 = arith.constant 0 : index
    %c0_4 = arith.constant 0 : index
    %2 = vector.load %arg5[%c0_3, %c0_4] : memref<16x64xf32, #tpu.memory_space<vmem>>, vector<16x64xf32>
    %3 = vector.shape_cast %2 : vector<16x64xf32> to vector<1x16x64xf32>
    %4 = vector.broadcast %3 : vector<1x16x64xf32> to vector<4x16x64xf32>
    %c0_5 = arith.constant 0 : index
    %c0_6 = arith.constant 0 : index
    %5 = vector.load %arg6[%c0_5, %c0_6] : memref<64x16xf32, #tpu.memory_space<vmem>>, vector<64x16xf32>
    %6 = vector.shape_cast %5 : vector<64x16xf32> to vector<1x64x16xf32>
    %7 = vector.broadcast %6 : vector<1x64x16xf32> to vector<4x64x16xf32>
    %cst = arith.constant dense<0.000000e+00> : vector<4x16x64xf32>
    %8 = tpu.matmul %4, %1, %cst {dimension_numbers = #tpu.dot_dimension_numbers<[2], [1], [1], [2], [0, 0, 0, 1, 1, 2], [0], [0]>} : vector<4x16x64xf32>, vector<4x64x64xf32>, vector<4x16x64xf32> -> vector<4x16x64xf32>
    %cst_7 = arith.constant dense<0.000000e+00> : vector<4x16x16xf32>
    %9 = tpu.matmul %8, %7, %cst_7 {dimension_numbers = #tpu.dot_dimension_numbers<[2], [1], [1], [2], [0, 0, 0, 1, 1, 2], [0], [0]>} : vector<4x16x64xf32>, vector<4x64x16xf32>, vector<4x16x16xf32> -> vector<4x16x16xf32>
    %c0_8 = arith.constant 0 : index
    %c0_9 = arith.constant 0 : index
    %c0_10 = arith.constant 0 : index
    %c0_11 = arith.constant 0 : index
    %10 = vector.load %arg11[%c0_8, %c0_9, %c0_10, %c0_11] : memref<1x26x16x16xf32, #tpu.memory_space<vmem>>, vector<1x4x16x16xf32>
    %11 = vector.shape_cast %10 : vector<1x4x16x16xf32> to vector<4x16x16xf32>
    %12 = vector.shape_cast %9 : vector<4x16x16xf32> to vector<1x4x16x16xf32>
    tpu.vector_store %arg11[%c0_8, %c0_9, %c0_10, %c0_11], %12 {strides = array<i32>} : memref<1x26x16x16xf32, #tpu.memory_space<vmem>>, vector<1x4x16x16xf32>,
    %c0_12 = arith.constant 0 : index
    %c0_13 = arith.constant 0 : index
    %c0_14 = arith.constant 0 : index
    %c0_15 = arith.constant 0 : index
    %13 = vector.load %arg2[%c0_12, %c0_13, %c0_14, %c0_15] : memref<1x6x32x32xf32, #tpu.memory_space<vmem>>, vector<1x6x32x32xf32>
    %14 = vector.shape_cast %13 : vector<1x6x32x32xf32> to vector<6x32x32xf32>
    %c0_16 = arith.constant 0 : index
    %c0_17 = arith.constant 0 : index
    %15 = vector.load %arg7[%c0_16, %c0_17] : memref<16x32xf32, #tpu.memory_space<vmem>>, vector<16x32xf32>
    %16 = vector.shape_cast %15 : vector<16x32xf32> to vector<1x16x32xf32>
    %17 = vector.broadcast %16 : vector<1x16x32xf32> to vector<6x16x32xf32>
    %c0_18 = arith.constant 0 : index
    %c0_19 = arith.constant 0 : index
    %18 = vector.load %arg8[%c0_18, %c0_19] : memref<32x16xf32, #tpu.memory_space<vmem>>, vector<32x16xf32>
    %19 = vector.shape_cast %18 : vector<32x16xf32> to vector<1x32x16xf32>
    %20 = vector.broadcast %19 : vector<1x32x16xf32> to vector<6x32x16xf32>
    %cst_20 = arith.constant dense<0.000000e+00> : vector<6x16x32xf32>
    %21 = tpu.matmul %17, %14, %cst_20 {dimension_numbers = #tpu.dot_dimension_numbers<[2], [1], [1], [2], [0, 0, 0, 1, 1, 2], [0], [0]>} : vector<6x16x32xf32>, vector<6x32x32xf32>, vector<6x16x32xf32> -> vector<6x16x32xf32>
    %cst_21 = arith.constant dense<0.000000e+00> : vector<6x16x16xf32>
    %22 = tpu.matmul %21, %20, %cst_21 {dimension_numbers = #tpu.dot_dimension_numbers<[2], [1], [1], [2], [0, 0, 0, 1, 1, 2], [0], [0]>} : vector<6x16x32xf32>, vector<6x32x16xf32>, vector<6x16x16xf32> -> vector<6x16x16xf32>
    %c0_22 = arith.constant 0 : index
    %c4 = arith.constant 4 : index
    %c0_23 = arith.constant 0 : index
    %c0_24 = arith.constant 0 : index
    %23 = vector.load %arg11[%c0_22, %c4, %c0_23, %c0_24] : memref<1x26x16x16xf32, #tpu.memory_space<vmem>>, vector<1x6x16x16xf32>
    %24 = vector.shape_cast %23 : vector<1x6x16x16xf32> to vector<6x16x16xf32>
    %25 = vector.shape_cast %22 : vector<6x16x16xf32> to vector<1x6x16x16xf32>
    tpu.vector_store %arg11[%c0_22, %c4, %c0_23, %c0_24], %25 {strides = array<i32>} : memref<1x26x16x16xf32, #tpu.memory_space<vmem>>, vector<1x6x16x16xf32>,
    %c0_25 = arith.constant 0 : index
    %c0_26 = arith.constant 0 : index
    %c0_27 = arith.constant 0 : index
    %c0_28 = arith.constant 0 : index
    %26 = vector.load %arg3[%c0_25, %c0_26, %c0_27, %c0_28] : memref<1x8x16x16xf32, #tpu.memory_space<vmem>>, vector<1x8x16x16xf32>
    %27 = vector.shape_cast %26 : vector<1x8x16x16xf32> to vector<8x16x16xf32>
    %c0_29 = arith.constant 0 : index
    %c10 = arith.constant 10 : index
    %c0_30 = arith.constant 0 : index
    %c0_31 = arith.constant 0 : index
    %28 = vector.load %arg11[%c0_29, %c10, %c0_30, %c0_31] : memref<1x26x16x16xf32, #tpu.memory_space<vmem>>, vector<1x8x16x16xf32>
    %29 = vector.shape_cast %28 : vector<1x8x16x16xf32> to vector<8x16x16xf32>
    %30 = vector.shape_cast %27 : vector<8x16x16xf32> to vector<1x8x16x16xf32>
    tpu.vector_store %arg11[%c0_29, %c10, %c0_30, %c0_31], %30 {strides = array<i32>} : memref<1x26x16x16xf32, #tpu.memory_space<vmem>>, vector<1x8x16x16xf32>,
    %c0_32 = arith.constant 0 : index
    %c0_33 = arith.constant 0 : index
    %c0_34 = arith.constant 0 : index
    %c0_35 = arith.constant 0 : index
    %31 = vector.load %arg4[%c0_32, %c0_33, %c0_34, %c0_35] : memref<1x8x8x8xf32, #tpu.memory_space<vmem>>, vector<1x8x8x8xf32>
    %32 = vector.shape_cast %31 : vector<1x8x8x8xf32> to vector<8x8x8xf32>
    %c0_36 = arith.constant 0 : index
    %c0_37 = arith.constant 0 : index
    %33 = vector.load %arg9[%c0_36, %c0_37] : memref<16x8xf32, #tpu.memory_space<vmem>>, vector<16x8xf32>
    %34 = vector.shape_cast %33 : vector<16x8xf32> to vector<1x16x8xf32>
    %35 = vector.broadcast %34 : vector<1x16x8xf32> to vector<8x16x8xf32>
    %c0_38 = arith.constant 0 : index
    %c0_39 = arith.constant 0 : index
    %36 = vector.load %arg10[%c0_38, %c0_39] : memref<8x16xf32, #tpu.memory_space<vmem>>, vector<8x16xf32>
    %37 = vector.shape_cast %36 : vector<8x16xf32> to vector<1x8x16xf32>
    %38 = vector.broadcast %37 : vector<1x8x16xf32> to vector<8x8x16xf32>
    %cst_40 = arith.constant dense<0.000000e+00> : vector<8x16x8xf32>
    %39 = tpu.matmul %35, %32, %cst_40 {dimension_numbers = #tpu.dot_dimension_numbers<[2], [1], [1], [2], [0, 0, 0, 1, 1, 2], [0], [0]>} : vector<8x16x8xf32>, vector<8x8x8xf32>, vector<8x16x8xf32> -> vector<8x16x8xf32>
    %cst_41 = arith.constant dense<0.000000e+00> : vector<8x16x16xf32>
    %40 = tpu.matmul %39, %38, %cst_41 {dimension_numbers = #tpu.dot_dimension_numbers<[2], [1], [1], [2], [0, 0, 0, 1, 1, 2], [0], [0]>} : vector<8x16x8xf32>, vector<8x8x16xf32>, vector<8x16x16xf32> -> vector<8x16x16xf32>
    %c0_42 = arith.constant 0 : index
    %c18 = arith.constant 18 : index
    %c0_43 = arith.constant 0 : index
    %c0_44 = arith.constant 0 : index
    %41 = vector.load %arg11[%c0_42, %c18, %c0_43, %c0_44] : memref<1x26x16x16xf32, #tpu.memory_space<vmem>>, vector<1x8x16x16xf32>
    %42 = vector.shape_cast %41 : vector<1x8x16x16xf32> to vector<8x16x16xf32>
    %43 = vector.shape_cast %40 : vector<8x16x16xf32> to vector<1x8x16x16xf32>
    tpu.vector_store %arg11[%c0_42, %c18, %c0_43, %c0_44], %43 {strides = array<i32>} : memref<1x26x16x16xf32, #tpu.memory_space<vmem>>, vector<1x8x16x16xf32>,
    return
  }
  func.func @transform_0(%arg0: i32) -> (i32, i32, i32, i32) {
    %c0_i32 = arith.constant 0 : i32
    %c0_i32_0 = arith.constant 0 : i32
    %c0_i32_1 = arith.constant 0 : i32
    %c0_i32_2 = arith.constant 0 : i32
    return %arg0, %c0_i32, %c0_i32_0, %c0_i32_1 : i32, i32, i32, i32
  }
  func.func @transform_1(%arg0: i32) -> (i32, i32, i32, i32) {
    %c0_i32 = arith.constant 0 : i32
    %c0_i32_0 = arith.constant 0 : i32
    %c0_i32_1 = arith.constant 0 : i32
    %c0_i32_2 = arith.constant 0 : i32
    return %arg0, %c0_i32, %c0_i32_0, %c0_i32_1 : i32, i32, i32, i32
  }
  func.func @transform_2(%arg0: i32) -> (i32, i32, i32, i32) {
    %c0_i32 = arith.constant 0 : i32
    %c0_i32_0 = arith.constant 0 : i32
    %c0_i32_1 = arith.constant 0 : i32
    %c0_i32_2 = arith.constant 0 : i32
    return %arg0, %c0_i32, %c0_i32_0, %c0_i32_1 : i32, i32, i32, i32
  }
  func.func @transform_3(%arg0: i32) -> (i32, i32, i32, i32) {
    %c0_i32 = arith.constant 0 : i32
    %c0_i32_0 = arith.constant 0 : i32
    %c0_i32_1 = arith.constant 0 : i32
    %c0_i32_2 = arith.constant 0 : i32
    return %arg0, %c0_i32, %c0_i32_0, %c0_i32_1 : i32, i32, i32, i32
  }
  func.func @transform_4(%arg0: i32) -> (i32, i32) {
    %c0_i32 = arith.constant 0 : i32
    %c0_i32_0 = arith.constant 0 : i32
    %c0_i32_1 = arith.constant 0 : i32
    return %c0_i32, %c0_i32_0 : i32, i32
  }
  func.func @transform_5(%arg0: i32) -> (i32, i32) {
    %c0_i32 = arith.constant 0 : i32
    %c0_i32_0 = arith.constant 0 : i32
    %c0_i32_1 = arith.constant 0 : i32
    return %c0_i32, %c0_i32_0 : i32, i32
  }
  func.func @transform_6(%arg0: i32) -> (i32, i32) {
    %c0_i32 = arith.constant 0 : i32
    %c0_i32_0 = arith.constant 0 : i32
    %c0_i32_1 = arith.constant 0 : i32
    return %c0_i32, %c0_i32_0 : i32, i32
  }
  func.func @transform_7(%arg0: i32) -> (i32, i32) {
    %c0_i32 = arith.constant 0 : i32
    %c0_i32_0 = arith.constant 0 : i32
    %c0_i32_1 = arith.constant 0 : i32
    return %c0_i32, %c0_i32_0 : i32, i32
  }
  func.func @transform_8(%arg0: i32) -> (i32, i32) {
    %c0_i32 = arith.constant 0 : i32
    %c0_i32_0 = arith.constant 0 : i32
    %c0_i32_1 = arith.constant 0 : i32
    return %c0_i32, %c0_i32_0 : i32, i32
  }
  func.func @transform_9(%arg0: i32) -> (i32, i32) {
    %c0_i32 = arith.constant 0 : i32
    %c0_i32_0 = arith.constant 0 : i32
    %c0_i32_1 = arith.constant 0 : i32
    return %c0_i32, %c0_i32_0 : i32, i32
  }
  func.func @transform_10(%arg0: i32) -> (i32, i32, i32, i32) {
    %c0_i32 = arith.constant 0 : i32
    %c0_i32_0 = arith.constant 0 : i32
    %c0_i32_1 = arith.constant 0 : i32
    %c0_i32_2 = arith.constant 0 : i32
    return %arg0, %c0_i32, %c0_i32_0, %c0_i32_1 : i32, i32, i32, i32
  }
}

</mosaic_0001>

<bundles_post_ra>
// kernel: simfusion4_pallas.1
= control target key start
LH: loop header
LB: loop body
LE: loop exit
PB: predicated region body
PF: predicated region fallthrough
CT: control target
= control target key end

     0   :  { %s5758_s0 = inlined_call_operand.hbm [shape: f32[2,4,64,64], index: 0, kind: input, shape index: {}]   ;;  %s5759_s1 = inlined_call_operand.hbm [shape: f32[2,6,32,32], index: 1, kind: input, shape index: {}]   ;;  %s5760_s2 = inlined_call_operand.hbm [shape: f32[2,8,16,16], index: 2, kind: input, shape index: {}]   ;;  %s5761_s3 = inlined_call_operand.hbm [shape: f32[2,8,8,8], index: 3, kind: input, shape index: {}]   ;;  %s5762_s4 = inlined_call_operand.hbm [shape: f32[16,64], index: 4, kind: input, shape index: {}]   ;;  %s5763_s5 = inlined_call_operand.hbm [shape: f32[64,16], index: 5, kind: input, shape index: {}]   ;;  %s5764_s6 = inlined_call_operand.hbm [shape: f32[16,32], index: 6, kind: input, shape index: {}]   ;;  %s5765_s7 = inlined_call_operand.hbm [shape: f32[32,16], index: 7, kind: input, shape index: {}]   ;;  %s5766_s8 = inlined_call_operand.vmem [shape: f32[16,8], index: 8, kind: input, shape index: {}]   ;;  %s5767_s9 = inlined_call_operand.vmem [shape: f32[8,16], index: 9, kind: input, shape index: {}]   ;;  %s5768_s10 = inlined_call_operand.vmem [shape: f32[2,26,16,16], index: 10, kind: output, shape index: {}]  }
   0x1   :  { %5788 = sst [smem:[#allocation24_spill]] %s5759_s1 }
   0x2   :  { %5789 = sst [smem:[#allocation25_spill]] %s5762_s4 }
   0x3   :  { %5790 = sst [smem:[#allocation26_spill]] %s5763_s5 }
   0x4   :  { %5791 = sst [smem:[#allocation27_spill]] %s5766_s8 }
   0x5   :  { %5792 = sst [smem:[#allocation28_spill]] %s5767_s9 }
   0x6   :  { %15 = vsyncpa [#allocation3], 0 }
   0x7   :  { %17 = vsyncpa [#allocation3 + $0x1], 0 }
   0x8   :  { %18 = vsyncpa [#allocation5], 0 }
   0x9   :  { %20 = vsyncpa [#allocation5 + $0x1], 0 }
   0xa   :  { %21 = vsyncpa [#allocation8], 0 }
   0xb   :  { %23 = vsyncpa [#allocation8 + $0x1], 0 }
   0xc   :  { %24 = vsyncpa [#allocation11], 0 }
   0xd   :  { %25 = vsyncpa [#allocation14], 0  ;;  %s5099_s13 = smov 0   ;;  %s5101_s14 = smov 0  }
   0xe   :  { %s5103_s15 = smov 0   ;;  %s5105_s16 = smov 0  }
   0xf LB: > { %5793 = sst [smem:[#allocation21_spill]] %s5028_s15  ;;  %s5118_s17 = sadd.s32 4294967295, %s5032_s16   ;;  %s5032_s16 = sphi %s5105_s16, %s5823_s16   ;;  %s5028_s15 = sphi %s5103_s15, %s5825_s15   ;;  %s5024_s14 = sphi %s5101_s14, %s5827_s14   ;;  %s5020_s13 = sphi %s5099_s13, %s5826_s13  }
  0x10   : > { %p51_p0 = scmp.ne.s32.totalorder %s5024_s14, %s5020_s13  ;;  %p5769_p1 = scmp.eq.s32.totalorder %s5118_s17, 0 }
  0x11   : > { %p3711_p2 = scmp.ge.s32.totalorder %s5032_s16, 1  ;;  %p292_p3 = scmp.lt.s32.totalorder %s5032_s16, 3 }
  0x12   : > { %p5126_p4 = por %p5769_p1, %p51_p0  ;;  %s5034_s20 = smov [#allocation9]  }
  0x13   : > { %p5130_p5 = pnand %p3711_p2, %p292_p3  ;;  %s304_s21 = sshll.u32 %s5034_s20, 4  ;;  %s305_s21 = int_to_ptr.vmem [resolvable:$true] %s304_s21 }
  0x14   : > { %s5794_s18 = scalar_select %p5126_p4, 1, 0 }
  0x15   : > { %s5795_s19 = scalar_select %p5130_p5, 1, 0 }
  0x16   : > { %p4673_p6 = pneg %p5130_p5  ;;  %s5035_s23 = smov [#allocation10]  }
  0x17   : > { %s317_s24 = sshll.u32 %s5035_s23, 4  ;;  %s5797_s4 = sld [smem:[#allocation25_spill]]  ;;  %s5142_s24 = int_to_ptr.vmem [resolvable:$true] %s317_s24 }
  0x18   : > { %p5138_p7 = pnand %p4673_p6, %p5769_p1 }
  0x1a   : > { %s5796_s22 = scalar_select %p5138_p7, 1, 0 }
  0x1b   : > { %p5152_p9 = pneg %p5138_p7 }
  0x1d   : > { %s4746_s27 = scalar_lea.hbm %s5797_s4, 256 }
  0x1e   : > { %p4747_p8 = scmp.ne.s32.totalorder %s5797_s4, %s4746_s27  ;;  %p4753_p12 = scmp.lt.u32.totalorder %s4746_s27, %s5797_s4 }
  0x1f   : > { %s5798_s30 = scalar_select %p5152_p9, 1, 0 }
  0x20   : > { %p4749_p10 = pnand %p5152_p9, %p4747_p8 }
  0x22   : > { %p4750_p11 = pneg %p4749_p10 }
  0x24   : > { %p4755_p13 = pnand %p4753_p12, %p4750_p11 }
  0x26   : > { %4758 = shalt.err (!%p4755_p13)
}
  0x27   : > { %s4759_s13 = scalar_lea.vmem %s305_s21, 256  ;;  %p4767_p6 = scmp.lt.s32.totalorder %s305_s21, %s305_s21 }
  0x28   : > { %p4760_p0 = scmp.ne.s32.totalorder %s305_s21, %s4759_s13  ;;  %p4768_p1 = scmp.lt.s32.totalorder %s4759_s13, %s4759_s13 }
  0x2a   : > { %p4762_p2 = pnand %p4760_p0, %p5152_p9  ;;  %p4769_p4 = por %p4768_p1, %p4767_p6 }
  0x2c   : > { %p4763_p3 = pneg %p4762_p2 }
  0x2e   : > { %p4770_p5 = pnand %p4769_p4, %p4763_p3 }
  0x30   : > { %4773 = shalt.err (!%p4770_p5)
}
  0x31   : > { %s5772_s20 = smov 128   ;;  %s5774_s23 = smov 8  }
  0x32   : > { %4676 = dma.hbm_to_vmem [thread:$0]  (!%p5138_p7), %s5797_s4, 256, %s305_s21, [#allocation8], %s5772_s20, %s5772_s20, %s5774_s23  }
  0x33   : > { %s5799_s5 = sld [smem:[#allocation26_spill]] }
  0x39   : > { %s4774_s29 = scalar_lea.hbm %s5799_s5, 1024 }
  0x3a   : > { %p4775_p1 = scmp.ne.s32.totalorder %s5799_s5, %s4774_s29  ;;  %p4781_p8 = scmp.lt.u32.totalorder %s4774_s29, %s5799_s5 }
  0x3c   : > { %p4777_p4 = pnand %p4775_p1, %p5152_p9 }
  0x3e   : > { %p4778_p5 = pneg %p4777_p4 }
  0x40   : > { %p4783_p10 = pnand %p4781_p8, %p4778_p5 }
  0x42   : > { %4786 = shalt.err (!%p4783_p10)
}
  0x43   : > { %s4787_s21 = scalar_lea.vmem %s5142_s24, 1024  ;;  %p4795_p0 = scmp.lt.s32.totalorder %s5142_s24, %s5142_s24 }
  0x44   : > { %p4788_p11 = scmp.ne.s32.totalorder %s5142_s24, %s4787_s21  ;;  %p4796_p2 = scmp.lt.s32.totalorder %s4787_s21, %s4787_s21 }
  0x46   : > { %p4790_p12 = pnand %p4788_p11, %p5152_p9  ;;  %p4797_p3 = por %p4796_p2, %p4795_p0 }
  0x48   : > { %p4791_p13 = pneg %p4790_p12 }
  0x4a   : > { %p4798_p6 = pnand %p4797_p3, %p4791_p13 }
  0x4c   : > { %4801 = shalt.err (!%p4798_p6)
}
  0x4d   : > { %4679 = dma.hbm_to_vmem [thread:$0]  (!%p5138_p7), %s5799_s5, 1024, %s5142_s24, [#allocation11], %s5772_s20, %s5772_s20, %s5774_s23  }
  0x4e   : > { %s5198_s26 = sadd.s32 1, %s5032_s16   ;;  %s38_s27 = sadd.s32 1, %s5028_s15 }
  0x4f   : > { %5800 = sst [smem:[#allocation22_spill]] %s5198_s26  ;;  %s35_s28 = ssub.s32 %s5032_s16, %s5198_s26 }
  0x50   : > { %p45_p1 = scmp.ne.s32.totalorder %s5028_s15, %s5024_s14  ;;  %p36_p4 = scmp.eq.s32.totalorder %s35_s28, 0 }
  0x51   : > { %p46_p5 = scmp.eq.s32.totalorder %s5032_s16, 0  ;;  %p4703_p8 = scmp.lt.s32.totalorder %s5032_s16, 2 }
  0x52   : > { %s5208_s29 = sand.u32 1, %s5028_s15   ;;  %s4646_s21 = smul.u32 3072, %s5032_s16 }
  0x53   : > { %s5211_s11 = scalar_select %p36_p4, %s5028_s15, %s38_s27  }
  0x54   : > { %p47_p10 = por %p46_p5, %p45_p1  ;;  %s4645_s13 = smul.u32 192, %s5208_s29 }
  0x55   : > { %5801 = sst [smem:[#allocation23_spill]] %s5211_s11  ;;  %s5803_s1 = sld [smem:[#allocation24_spill]] }
  0x56   : > { %p5215_p11 = pnand %p4703_p8, %p47_p10  ;;  %s388_s27 = scalar_lea.vmem [#allocation4], %s4645_s13 }
  0x57   : > { %s395_s20 = sshll.u32 %s388_s27, 4  ;;  %s5038_s23 = smov [#allocation12]   ;;  %s5225_s20 = int_to_ptr.vmem [resolvable:$true] %s395_s20 }
  0x58   : > { %s5802_s24 = scalar_select %p5215_p11, 1, 0 }
  0x59   : > { %s5227_s12 = sshll.u32 %s5038_s23, 4  ;;  %s5804_s4 = sand.u32 1, %s5032_s16   ;;  %s331_s12 = int_to_ptr.vmem [resolvable:$true] %s5227_s12 }
  0x5a   : > { %s5231_s5 = scalar_lea.sflag [#allocation5], %s5804_s4  ;;  %p5237_p13 = pneg %p5215_p11 }
  0x5b   : > { %s5223_s28 = scalar_lea.hbm %s5803_s1, %s4646_s21  ;;  %s4807_s25 = scalar_lea.hbm %s5803_s1, 6144 }
  0x5c   : > { %s4802_s11 = scalar_lea.hbm %s5223_s28, 3072  ;;  %p4808_p3 = scmp.lt.u32.totalorder %s5223_s28, %s5803_s1 }
  0x5d   : > { %p4803_p12 = scmp.ne.s32.totalorder %s5223_s28, %s4802_s11  ;;  %p4809_p6 = scmp.lt.u32.totalorder %s4807_s25, %s4802_s11 }
  0x5e   : > { %s5805_s21 = scalar_select %p5237_p13, 1, 0 }
  0x5f   : > { %p4805_p0 = pnand %p5237_p13, %p4803_p12  ;;  %p4810_p1 = por %p4809_p6, %p4808_p3 }
  0x60   : > { %p4811_p4 = scmp.lt.u32.totalorder %s4802_s11, %s5223_s28 }
  0x61   : > { %p4806_p2 = pneg %p4805_p0 }
  0x62   : > { %p4812_p5 = por %p4811_p4, %p4810_p1 }
  0x64   : > { %p4813_p8 = pnand %p4812_p5, %p4806_p2 }
  0x66   : > { %4816 = shalt.err (!%p4813_p8)
}
  0x67   : > { %s4817_s4 = scalar_lea.vmem %s5225_s20, 3072  ;;  %s5039_s13 = smov [#allocation4]  }
  0x68   : > { %p4818_p10 = scmp.ne.s32.totalorder %s5225_s20, %s4817_s4  ;;  %s4822_s9 = sshll.u32 %s5039_s13, 4  ;;  %s4823_s9 = int_to_ptr.vmem [resolvable:$false] %s4822_s9 }
  0x69   : > { %s4824_s23 = scalar_lea.vmem %s4823_s9, 6144  ;;  %p4825_p7 = scmp.lt.s32.totalorder %s5225_s20, %s4823_s9 }
  0x6a   : > { %p4820_p12 = pnand %p4818_p10, %p5237_p13  ;;  %p4826_p9 = scmp.lt.s32.totalorder %s4824_s23, %s4817_s4 }
  0x6c   : > { %p4821_p0 = pneg %p4820_p12  ;;  %p4827_p3 = por %p4826_p9, %p4825_p7 }
  0x6e   : > { %p4828_p6 = pnand %p4827_p3, %p4821_p0 }
  0x70   : > { %4831 = shalt.err (!%p4828_p6)
}
  0x71   : > { %s5806_s11 = smov 8   ;;  %s5807_s25 = smov 128  }
  0x72   : > { %4692 = dma.hbm_to_vmem [thread:$0]  (!%p5215_p11), %s5223_s28, 3072, %s5225_s20, %s5231_s5, %s5807_s25, %s5807_s25, %s5806_s11  }
  0x73   : > { %s4832_s9 = scalar_lea.hbm %s5764_s6, 256  ;;  %p5808_p9 = scmp.ne.s32.totalorder %s5798_s30, 0 }
  0x74   : > { %p4833_p7 = scmp.ne.s32.totalorder %s5764_s6, %s4832_s9  ;;  %p4839_p4 = scmp.lt.u32.totalorder %s4832_s9, %s5764_s6 }
  0x76   : > { %p4835_p2 = pnand %p4833_p7, %p5808_p9 }
  0x78   : > { %p4836_p1 = pneg %p4835_p2 }
  0x7a   : > { %p4841_p5 = pnand %p4839_p4, %p4836_p1 }
  0x7c   : > { %4844 = shalt.err (!%p4841_p5)
}
  0x7d   : > { %s4845_s26 = scalar_lea.vmem %s331_s12, 256  ;;  %p4853_p0 = scmp.lt.s32.totalorder %s331_s12, %s331_s12 }
  0x7e   : > { %p4846_p8 = scmp.ne.s32.totalorder %s331_s12, %s4845_s26  ;;  %p4854_p3 = scmp.lt.s32.totalorder %s4845_s26, %s4845_s26 }
  0x80   : > { %p4848_p10 = pnand %p4846_p8, %p5808_p9  ;;  %p4855_p6 = por %p4854_p3, %p4853_p0 }
  0x82   : > { %p4849_p12 = pneg %p4848_p10 }
  0x84   : > { %p4856_p11 = pnand %p4855_p6, %p4849_p12 }
  0x86   : > { %4859 = shalt.err (!%p4856_p11)
}
  0x87   : > { %p5809_p7 = scmp.ne.s32.totalorder %s5796_s22, 0  ;;  %s5040_s20 = smov [#allocation13]  }
  0x88   : > { %s343_s28 = sshll.u32 %s5040_s20, 4  ;;  %s3717_s27 = sshll.u32 %s5208_s29, 8  ;;  %s344_s28 = int_to_ptr.vmem [resolvable:$true] %s343_s28 }
  0x89   : > { %4682 = dma.hbm_to_vmem [thread:$0]  (!%p5809_p7), %s5764_s6, 256, %s331_s12, [#allocation11], %s5807_s25, %s5807_s25, %s5806_s11  }
  0x8a   : > { %s4860_s9 = scalar_lea.hbm %s5765_s7, 512 }
  0x8b   : > { %p4861_p11 = scmp.ne.s32.totalorder %s5765_s7, %s4860_s9  ;;  %p4867_p4 = scmp.lt.u32.totalorder %s4860_s9, %s5765_s7 }
  0x8d   : > { %p4863_p2 = pnand %p4861_p11, %p5808_p9 }
  0x8f   : > { %p4864_p1 = pneg %p4863_p2 }
  0x91   : > { %p4869_p5 = pnand %p4867_p4, %p4864_p1 }
  0x93   : > { %4872 = shalt.err (!%p4869_p5)
}
  0x94   : > { %s4873_s12 = scalar_lea.vmem %s344_s28, 512  ;;  %p4881_p0 = scmp.lt.s32.totalorder %s344_s28, %s344_s28 }
  0x95   : > { %p4874_p8 = scmp.ne.s32.totalorder %s344_s28, %s4873_s12  ;;  %p4882_p3 = scmp.lt.s32.totalorder %s4873_s12, %s4873_s12 }
  0x97   : > { %p4876_p10 = pnand %p4874_p8, %p5808_p9  ;;  %p4883_p6 = por %p4882_p3, %p4881_p0 }
  0x99   : > { %p4877_p12 = pneg %p4876_p10 }
  0x9b   : > { %p4884_p13 = pnand %p4883_p6, %p4877_p12 }
  0x9d   : > { %4887 = shalt.err (!%p4884_p13)
}
  0x9e   : > { %4685 = dma.hbm_to_vmem [thread:$0]  (!%p5809_p7), %s5765_s7, 512, %s344_s28, [#allocation14], %s5807_s25, %s5807_s25, %s5806_s11  }
  0x9f   : > { %s3854_s30 = sshll.u32 %s5032_s16, 12  ;;  %s367_s22 = scalar_lea.vmem [#allocation2], %s3717_s27 }
  0xa0   : > { %s5312_s26 = scalar_lea.hbm %s5758_s0, %s3854_s30  ;;  %s374_s9 = sshll.u32 %s367_s22, 4  ;;  %s5314_s9 = int_to_ptr.vmem [resolvable:$true] %s374_s9 }
  0xa1   : > { %s3721_s4 = sshll.u32 %s5208_s29, 7  ;;  %s364_s23 = scalar_lea.sflag [#allocation3], %s5208_s29 }
  0xa2   : > { %s4888_s1 = scalar_lea.hbm %s5312_s26, 4096  ;;  %p5810_p9 = scmp.ne.s32.totalorder %s5805_s21, 0 }
  0xa3   : > { %p4889_p13 = scmp.ne.s32.totalorder %s5312_s26, %s4888_s1  ;;  %s4893_s8 = scalar_lea.hbm %s5758_s0, 8192 }
  0xa4   : > { %p4894_p2 = scmp.lt.u32.totalorder %s5312_s26, %s5758_s0  ;;  %p4895_p1 = scmp.lt.u32.totalorder %s4893_s8, %s4888_s1 }
  0xa5   : > { %p4891_p7 = pnand %p4889_p13, %p5810_p9  ;;  %p4897_p5 = scmp.lt.u32.totalorder %s4888_s1, %s5312_s26 }
  0xa6   : > { %p4896_p4 = por %p4895_p1, %p4894_p2 }
  0xa7   : > { %p4892_p11 = pneg %p4891_p7 }
  0xa8   : > { %p4898_p8 = por %p4897_p5, %p4896_p4 }
  0xaa   : > { %p4899_p10 = pnand %p4898_p8, %p4892_p11 }
  0xac   : > { %4902 = shalt.err (!%p4899_p10)
}
  0xad   : > { %s4903_s27 = scalar_lea.vmem %s5314_s9, 4096  ;;  %s5041_s20 = smov [#allocation2]  }
  0xae   : > { %p4904_p12 = scmp.ne.s32.totalorder %s5314_s9, %s4903_s27  ;;  %s4908_s13 = sshll.u32 %s5041_s20, 4  ;;  %s4909_s13 = int_to_ptr.vmem [resolvable:$false] %s4908_s13 }
  0xaf   : > { %s4910_s22 = scalar_lea.vmem %s4909_s13, 8192  ;;  %p4911_p6 = scmp.lt.s32.totalorder %s5314_s9, %s4909_s13 }
  0xb0   : > { %p4906_p0 = pnand %p4904_p12, %p5810_p9  ;;  %p4912_p13 = scmp.lt.s32.totalorder %s4910_s22, %s4903_s27 }
  0xb2   : > { %p4907_p3 = pneg %p4906_p0  ;;  %p4913_p7 = por %p4912_p13, %p4911_p6 }
  0xb4   : > { %p4914_p2 = pnand %p4913_p7, %p4907_p3 }
  0xb6   : > { %4917 = shalt.err (!%p4914_p2)
}
  0xb7   : > { %p5811_p11 = scmp.ne.s32.totalorder %s5802_s24, 0  ;;  %s3855_s1 = sshll.u32 %s5032_s16, 11 }
  0xb8   : > { %s5348_s8 = scalar_lea.hbm %s5760_s2, %s3855_s1  ;;  %s409_s15 = scalar_lea.vmem [#allocation6], %s3721_s4 }
  0xb9   : > { %4689 = dma.hbm_to_vmem [thread:$0]  (!%p5811_p11), %s5312_s26, 4096, %s5314_s9, %s364_s23, %s5807_s25, %s5807_s25, %s5806_s11  }
  0xba   : > { %s416_s30 = sshll.u32 %s409_s15, 4  ;;  %s3724_s27 = sshll.u32 %s5208_s29, 6  ;;  %s5352_s30 = int_to_ptr.vmem [resolvable:$true] %s416_s30 }
  0xbb   : > { %s4918_s20 = scalar_lea.hbm %s5348_s8, 2048  ;;  %s4923_s23 = scalar_lea.hbm %s5760_s2, 4096 }
  0xbc   : > { %p4919_p1 = scmp.ne.s32.totalorder %s5348_s8, %s4918_s20  ;;  %p4924_p8 = scmp.lt.u32.totalorder %s5348_s8, %s5760_s2 }
  0xbd   : > { %p4925_p10 = scmp.lt.u32.totalorder %s4923_s23, %s4918_s20  ;;  %p4927_p0 = scmp.lt.u32.totalorder %s4918_s20, %s5348_s8 }
  0xbe   : > { %p4921_p4 = pnand %p4919_p1, %p5810_p9 }
  0xbf   : > { %p4926_p12 = por %p4925_p10, %p4924_p8 }
  0xc0   : > { %p4922_p5 = pneg %p4921_p4 }
  0xc1   : > { %p4928_p3 = por %p4927_p0, %p4926_p12 }
  0xc3   : > { %p4929_p6 = pnand %p4928_p3, %p4922_p5 }
  0xc5   : > { %4932 = shalt.err (!%p4929_p6)
}
  0xc6   : > { %s4933_s4 = scalar_lea.vmem %s5352_s30, 2048  ;;  %s5042_s1 = smov [#allocation6]  }
  0xc7   : > { %p4934_p13 = scmp.ne.s32.totalorder %s5352_s30, %s4933_s4  ;;  %s4938_s28 = sshll.u32 %s5042_s1, 4  ;;  %s4939_s28 = int_to_ptr.vmem [resolvable:$false] %s4938_s28 }
  0xc8   : > { %s4940_s12 = scalar_lea.vmem %s4939_s28, 4096  ;;  %p4941_p1 = scmp.lt.s32.totalorder %s5352_s30, %s4939_s28 }
  0xc9   : > { %p4936_p7 = pnand %p4934_p13, %p5810_p9  ;;  %p4942_p4 = scmp.lt.s32.totalorder %s4940_s12, %s4933_s4 }
  0xcb   : > { %p4937_p2 = pneg %p4936_p7  ;;  %p4943_p8 = por %p4942_p4, %p4941_p1 }
  0xcd   : > { %p4944_p10 = pnand %p4943_p8, %p4937_p2 }
  0xcf   : > { %4947 = shalt.err (!%p4944_p10)
}
  0xd0   : > { %4695 = dma.hbm_to_vmem [thread:$0]  (!%p5811_p11), %s5348_s8, 2048, %s5352_s30, %s5231_s5, %s5807_s25, %s5807_s25, %s5806_s11  }
  0xd1   : > { %s3856_s15 = sshll.u32 %s5032_s16, 10  ;;  %s430_s23 = scalar_lea.vmem [#allocation7], %s3724_s27 }
  0xd2   : > { %s5384_s9 = scalar_lea.hbm %s5761_s3, %s3856_s15  ;;  %s437_s13 = sshll.u32 %s430_s23, 4  ;;  %s5388_s13 = int_to_ptr.vmem [resolvable:$true] %s437_s13 }
  0xd3   : > { %s5812_s22 = sand.u32 1, %s5032_s16   ;;  %s4948_s1 = scalar_lea.hbm %s5384_s9, 1024 }
  0xd4   : > { %s5392_s4 = scalar_lea.sflag [#allocation8], %s5812_s22  ;;  %p4949_p5 = scmp.ne.s32.totalorder %s5384_s9, %s4948_s1 }
  0xd5   : > { %s4953_s29 = scalar_lea.hbm %s5761_s3, 2048  ;;  %p4954_p3 = scmp.lt.u32.totalorder %s5384_s9, %s5761_s3 }
  0xd6   : > { %p4951_p12 = pnand %p4949_p5, %p5810_p9  ;;  %p4955_p6 = scmp.lt.u32.totalorder %s4953_s29, %s4948_s1 }
  0xd7   : > { %p4957_p7 = scmp.lt.u32.totalorder %s4948_s1, %s5384_s9 }
  0xd8   : > { %p4952_p0 = pneg %p4951_p12  ;;  %p4956_p13 = por %p4955_p6, %p4954_p3 }
  0xda   : > { %p4958_p2 = por %p4957_p7, %p4956_p13 }
  0xdc   : > { %p4959_p1 = pnand %p4958_p2, %p4952_p0 }
  0xde   : > { %4962 = shalt.err (!%p4959_p1)
}
  0xdf   : > { %s4963_s16 = scalar_lea.vmem %s5388_s13, 1024  ;;  %s5043_s27 = smov [#allocation7]  }
  0xe0   : > { %p4964_p4 = scmp.ne.s32.totalorder %s5388_s13, %s4963_s16  ;;  %s4968_s12 = sshll.u32 %s5043_s27, 4  ;;  %s4969_s12 = int_to_ptr.vmem [resolvable:$false] %s4968_s12 }
  0xe1   : > { %s4970_s15 = scalar_lea.vmem %s4969_s12, 2048  ;;  %p4971_p5 = scmp.lt.s32.totalorder %s5388_s13, %s4969_s12 }
  0xe2   : > { %p4966_p8 = pnand %p4964_p4, %p5810_p9  ;;  %p4972_p12 = scmp.lt.s32.totalorder %s4970_s15, %s4963_s16 }
  0xe4   : > { %p4967_p10 = pneg %p4966_p8  ;;  %p4973_p3 = por %p4972_p12, %p4971_p5 }
  0xe6   : > { %p4974_p6 = pnand %p4973_p3, %p4967_p10 }
  0xe8   : > { %4977 = shalt.err (!%p4974_p6)
}
  0xe9   : > { %4698 = dma.hbm_to_vmem [thread:$0]  (!%p5811_p11), %s5384_s9, 1024, %s5388_s13, %s5392_s4, %s5807_s25, %s5807_s25, %s5806_s11  }
  0xea   : > { %p5813_p9 = scmp.ne.s32.totalorder %s5795_s19, 0 }
  0xeb   : > { %s451_s21 = sand.u32 (!%p5813_p9), 1, %s5024_s14   ;;  %p5814_p0 = scmp.ne.s32.totalorder (!%p5813_p9), %s5794_s18, 0 }
  0xec   : > { %449 = sbr.rel (%p5813_p9) target bundleno = 1200 (0x4b0), region = 60  ;;  %s3728_s20 = sshll.u32 (!%p5813_p9), %s451_s21, 8 }
  0xed   : > { %s452_s26 = scalar_lea.sflag (!%p5813_p9), [#allocation3], %s451_s21  ;;  %s5422_s23 = scalar_lea.vmem (!%p5813_p9), [#allocation2], %s3728_s20 }
  0xf3   : > { %4995 = dma.done.wait (%p5814_p0), %s452_s26, 4096  }
  0xf4   : > { %4997 = vsyncadd (%p5814_p0), %s452_s26, 4294963200  ;;  %s460_s24 = sand.u32 1, %s5118_s17   ;;  %s4647_s22 = smul.u32 192, %s451_s21 }
  0xf5   : > { %s461_s11 = scalar_lea.sflag [#allocation5], %s460_s24 }
  0xf6   : > { %s5429_s25 = scalar_lea.vmem [#allocation4], %s4647_s22 }
  0xf7   : > { %4999 = dma.done.wait (%p5814_p0), %s461_s11, 5120  }
  0xf8   : > { %5001 = vsyncadd (%p5814_p0), %s461_s11, 4294962176  ;;  %s3729_s19 = sshll.u32 %s451_s21, 7  ;;  %s3730_s9 = sshll.u32 %s451_s21, 6 }
  0xf9   : > { %s5435_s13 = scalar_lea.vmem [#allocation6], %s3729_s19  ;;  %s479_s4 = scalar_lea.sflag [#allocation8], %s460_s24 }
  0xfa   : > { %s5437_s1 = scalar_lea.vmem [#allocation7], %s3730_s9 }
  0xfb   : > { %5003 = dma.done.wait (%p5814_p0), %s479_s4, 1024  }
  0xfc   : > { %5005 = vsyncadd (%p5814_p0), %s479_s4, 4294966272  ;;  %p5815_p11 = scmp.eq.s32.totalorder %s5118_s17, 0 }
  0xfe   : > { %5007 = dma.done.wait (%p5815_p11), [#allocation8], 256   ;;  %p5816_p13 = pmov %p5815_p11 }
  0xff   : > { %p5817_p7 = pmov %p5815_p11 }
 0x100   : > { %5009 = vsyncadd (%p5816_p13), [#allocation8], 4294967040 }
 0x101   : > { %5011 = dma.done.wait (%p5817_p7), [#allocation11], 1280   ;;  %p5818_p2 = pmov %p5817_p7 }
 0x103   : > { %5013 = vsyncadd (%p5818_p2), [#allocation11], 4294966016  ;;  %p5819_p1 = pmov %p5818_p2 }
 0x105   : > { %5015 = dma.done.wait (%p5819_p1), [#allocation14], 512   ;;  %p5820_p4 = pmov %p5819_p1 }
 0x106   : > { %p550_p8 = scmp.lt.s32.totalorder %s5118_s17, 1  ;;  %vm1228_vm0 = vcmask 130048   ;;  %v2223_v0 = vld [vmem:[%s5435_s13] sm:$0xff]  ;;  %v2224_v1 = vld [vmem:[%s5435_s13 + $0x8] sm:$0xff]  ;;  %v2225_v2 = vld [vmem:[%s5435_s13 + $0x10] sm:$0xff]  ;;  %vm597_vm1 = vcmask 523264  }
 0x107   : > { %5017 = vsyncadd (%p5820_p4), [#allocation14], 4294966784  ;;  %v2226_v3 = vld [vmem:[%s5435_s13 + $0x18] sm:$0xff]  ;;  %v2227_v4 = vld [vmem:[%s5435_s13 + $0x20] sm:$0xff]  ;;  %vm1267_vm2 = vcmask 261120   ;;  %s5821_s28 = sld [smem:[#allocation27_spill]] }
 0x108   : > { %s5829_s17 = smov (!%p550_p8, %s5118_s17), 1  ;;  %v2228_v5 = vld [vmem:[%s5435_s13 + $0x28] sm:$0xff]  ;;  %v2229_v6 = vld [vmem:[%s5435_s13 + $0x30] sm:$0xff]  ;;  %v2230_v7 = vld [vmem:[%s5435_s13 + $0x38] sm:$0xff]  ;;  %vm2267_vm3 = vcmask 64512   ;;  %s5822_s21 = sld [smem:[#allocation28_spill]] }
 0x109   : > { %s4648_s18 = smul.u32 416, %s5829_s17  ;;  %v2231_v8 = vld [vmem:[%s5435_s13 + $0x40] sm:$0xff]  ;;  %v2232_v9 = vld [vmem:[%s5435_s13 + $0x48] sm:$0xff]  ;;  %v2233_v10 = vld [vmem:[%s5435_s13 + $0x50] sm:$0xff] }
 0x10a   : > { %v2234_v11 = vld [vmem:[%s5435_s13 + $0x58] sm:$0xff]  ;;  %v2235_v12 = vld [vmem:[%s5435_s13 + $0x60] sm:$0xff]  ;;  %v2236_v13 = vld [vmem:[%s5435_s13 + $0x68] sm:$0xff] }
 0x10b   : > { %s5460_s29 = scalar_lea.vmem %s5768_s10, %s4648_s18  ;;  %v2237_v14 = vld [vmem:[%s5435_s13 + $0x70] sm:$0xff]  ;;  %v2238_v15 = vld [vmem:[%s5435_s13 + $0x78] sm:$0xff]  ;;  %v555_v16 = vld [vmem:[%s5422_s23] sm:$0xff] }
 0x10c   : > { %3788 = vst.msk [vmem:[%s5460_s29 + $0xa0] sm:$0xff] %vm1228_vm0, %v2223_v0  ;;  %3789 = vst.msk [vmem:[%s5460_s29 + $0xa8] sm:$0xff] %vm1228_vm0, %v2224_v1  ;;  %v556_v17 = vld [vmem:[%s5422_s23 + $0x8] sm:$0xff]  ;;  %v563_v19 = vld [vmem:[%s5422_s23 + $0x40] sm:$0xff] }
 0x10d   : > { %3790 = vst.msk [vmem:[%s5460_s29 + $0xb0] sm:$0xff] %vm1228_vm0, %v2225_v2  ;;  %3791 = vst.msk [vmem:[%s5460_s29 + $0xb8] sm:$0xff] %vm1228_vm0, %v2226_v3  ;;  %v4421_v18 = vpack.c.bf16 %v556_v17, %v555_v16  ;;  %v564_v20 = vld [vmem:[%s5422_s23 + $0x48] sm:$0xff]  ;;  %v557_v21 = vld [vmem:[%s5422_s23 + $0x10] sm:$0xff] }
 0x10e   : > { %3792 = vst.msk [vmem:[%s5460_s29 + $0xc0] sm:$0xff] %vm1228_vm0, %v2227_v4  ;;  %3793 = vst.msk [vmem:[%s5460_s29 + $0xc8] sm:$0xff] %vm1228_vm0, %v2228_v5  ;;  %v4437_v22 = vpack.c.bf16 %v564_v20, %v563_v19  ;;  %v558_v23 = vld [vmem:[%s5422_s23 + $0x18] sm:$0xff]  ;;  %v565_v24 = vld [vmem:[%s5422_s23 + $0x50] sm:$0xff] }
 0x10f   : > { %3794 = vst.msk [vmem:[%s5460_s29 + $0xd0] sm:$0xff] %vm1228_vm0, %v2229_v6  ;;  %3795 = vst.msk [vmem:[%s5460_s29 + $0xd8] sm:$0xff] %vm1228_vm0, %v2230_v7  ;;  %v566_v25 = vld [vmem:[%s5422_s23 + $0x58] sm:$0xff]  ;;  %4422 = vmatprep.subr.bf16.mxu0 %v4421_v18  ;;  %v4425_v26 = vpack.c.bf16 %v558_v23, %v557_v21  ;;  %v559_v28 = vld [vmem:[%s5422_s23 + $0x20] sm:$0xff] }
 0x110   : > { %3796 = vst.msk [vmem:[%s5460_s29 + $0xe0] sm:$0xff] %vm1228_vm0, %v2231_v8  ;;  %3797 = vst.msk [vmem:[%s5460_s29 + $0xe8] sm:$0xff] %vm1228_vm0, %v2232_v9  ;;  %v4441_v27 = vpack.c.bf16 %v566_v25, %v565_v24  ;;  %v560_v29 = vld [vmem:[%s5422_s23 + $0x28] sm:$0xff]  ;;  %v567_v30 = vld [vmem:[%s5422_s23 + $0x60] sm:$0xff]  ;;  %4438 = vmatprep.subr.bf16.mxu1 %v4437_v22  ;;  %4424 = vmatpush3.bf16.msra.mxu0 %v4421_v18 }
 0x111   : > { %3798 = vst.msk [vmem:[%s5460_s29 + $0xf0] sm:$0xff] %vm1228_vm0, %v2233_v10  ;;  %3799 = vst.msk [vmem:[%s5460_s29 + $0xf8] sm:$0xff] %vm1228_vm0, %v2234_v11  ;;  %v568_v31 = vld [vmem:[%s5422_s23 + $0x68] sm:$0xff]  ;;  %4440 = vmatpush3.bf16.msra.mxu1 %v4437_v22  ;;  %4426 = vmatprep.subr.bf16.mxu0 %v4425_v26  ;;  %v4429_v32 = vpack.c.bf16 %v560_v29, %v559_v28  ;;  %v587_v33 = vld [vmem:[#allocation9] sm:$0xff] }
 0x112   : > { %3800 = vst.msk [vmem:[%s5460_s29 + $0x100] sm:$0xff] %vm1228_vm0, %v2235_v12  ;;  %3801 = vst.msk [vmem:[%s5460_s29 + $0x108] sm:$0xff] %vm1228_vm0, %v2236_v13  ;;  %4442 = vmatprep.subr.bf16.mxu1 %v4441_v27  ;;  %v4445_v34 = vpack.c.bf16 %v568_v31, %v567_v30  ;;  %v561_v35 = vld [vmem:[%s5422_s23 + $0x30] sm:$0xff]  ;;  %v562_v36 = vld [vmem:[%s5422_s23 + $0x38] sm:$0xff]  ;;  %4073 = vmatprep.mubr.msk.f32.mxu0 %vm597_vm1, %v587_v33 }
 0x113   : > { %3802 = vst.msk [vmem:[%s5460_s29 + $0x110] sm:$0xff] %vm1228_vm0, %v2237_v14  ;;  %3803 = vst.msk [vmem:[%s5460_s29 + $0x118] sm:$0xff] %vm1228_vm0, %v2238_v15  ;;  %v569_v37 = vld [vmem:[%s5422_s23 + $0x70] sm:$0xff]  ;;  %v570_v38 = vld [vmem:[%s5422_s23 + $0x78] sm:$0xff]  ;;  %4092 = vmatprep.mubr.msk.f32.mxu1 %vm597_vm1, %v587_v33  ;;  %v4433_v39 = vpack.c.bf16 %v562_v36, %v561_v35 }
 0x114   : > { %4428 = vmatpush3.bf16.msra.mxu0 %v4425_v26  ;;  %v4449_v40 = vpack.c.bf16 %v570_v38, %v569_v37  ;;  %v571_v41 = vld [vmem:[%s5422_s23 + $0x80] sm:$0xff]  ;;  %v572_v42 = vld [vmem:[%s5422_s23 + $0x88] sm:$0xff]  ;;  %v573_v47 = vld [vmem:[%s5422_s23 + $0x90] sm:$0xff] }
 0x115   : > { %4444 = vmatpush3.bf16.msra.mxu1 %v4441_v27  ;;  %4430 = vmatprep.subr.bf16.mxu0 %v4429_v32  ;;  %v579_v43 = vld [vmem:[%s5422_s23 + $0xc0] sm:$0xff]  ;;  %v580_v44 = vld [vmem:[%s5422_s23 + $0xc8] sm:$0xff]  ;;  %v4453_v45 = vpack.c.bf16 %v572_v42, %v571_v41  ;;  %v574_v48 = vld [vmem:[%s5422_s23 + $0x98] sm:$0xff] }
 0x116   : > { %4446 = vmatprep.subr.bf16.mxu1 %v4445_v34  ;;  %v4469_v46 = vpack.c.bf16 %v580_v44, %v579_v43  ;;  %v581_v49 = vld [vmem:[%s5422_s23 + $0xd0] sm:$0xff]  ;;  %v582_v50 = vld [vmem:[%s5422_s23 + $0xd8] sm:$0xff]  ;;  %v588_v51 = vld [vmem:[#allocation9 + $0x8] sm:$0xff]  ;;  %v4457_v52 = vpack.c.bf16 %v574_v48, %v573_v47 }
 0x117   : > { %v4473_v53 = vpack.c.bf16 %v582_v50, %v581_v49  ;;  %v575_v54 = vld [vmem:[%s5422_s23 + $0xa0] sm:$0xff]  ;;  %v576_v55 = vld [vmem:[%s5422_s23 + $0xa8] sm:$0xff]  ;;  %v577_v60 = vld [vmem:[%s5422_s23 + $0xb0] sm:$0xff] }
 0x118   : > { %4432 = vmatpush3.bf16.msra.mxu0 %v4429_v32  ;;  %v583_v56 = vld [vmem:[%s5422_s23 + $0xe0] sm:$0xff]  ;;  %v584_v57 = vld [vmem:[%s5422_s23 + $0xe8] sm:$0xff]  ;;  %v4461_v58 = vpack.c.bf16 %v576_v55, %v575_v54  ;;  %v578_v61 = vld [vmem:[%s5422_s23 + $0xb8] sm:$0xff] }
 0x119   : > { %4448 = vmatpush3.bf16.msra.mxu1 %v4445_v34  ;;  %4434 = vmatprep.subr.bf16.mxu0 %v4433_v39  ;;  %v4477_v59 = vpack.c.bf16 %v584_v57, %v583_v56  ;;  %v585_v62 = vld [vmem:[%s5422_s23 + $0xf0] sm:$0xff]  ;;  %v586_v63 = vld [vmem:[%s5422_s23 + $0xf8] sm:$0xff]  ;;  %v4465_v0 = vpack.c.bf16 %v578_v61, %v577_v60  ;;  %v591_v5 = vld [vmem:[#allocation10 + $0x10] sm:$0xff] }
 0x11a   : > { %4450 = vmatprep.subr.bf16.mxu1 %v4449_v40  ;;  %v4481_v1 = vpack.c.bf16 %v586_v63, %v585_v62  ;;  %v589_v2 = vld [vmem:[#allocation10] sm:$0xff]  ;;  %v590_v3 = vld [vmem:[#allocation10 + $0x8] sm:$0xff]  ;;  %v592_v6 = vld [vmem:[#allocation10 + $0x18] sm:$0xff] }
 0x11b   : > { %v4485_v4 = vpack.c.bf16 %v590_v3, %v589_v2  ;;  %v4489_v7 = vpack.c.bf16 %v592_v6, %v591_v5  ;;  %v593_v8 = vld [vmem:[#allocation10 + $0x20] sm:$0xff]  ;;  %v594_v9 = vld [vmem:[#allocation10 + $0x28] sm:$0xff]  ;;  %v595_v11 = vld [vmem:[#allocation10 + $0x30] sm:$0xff] }
 0x11c   : > { %4436 = vmatpush3.bf16.msra.mxu0 %v4433_v39  ;;  %v4493_v10 = vpack.c.bf16 %v594_v9, %v593_v8  ;;  %v596_v12 = vld [vmem:[#allocation10 + $0x38] sm:$0xff]  ;;  %v1237_v18 = vld [vmem:[%s5429_s25] sm:$0xff]  ;;  %v1239_v24 = vld [vmem:[%s5429_s25 + $0x10] sm:$0xff] }
 0x11d   : > { %4452 = vmatpush3.bf16.msra.mxu1 %v4449_v40  ;;  %4454 = vmatprep.subr.bf16.mxu0 %v4453_v45  ;;  %v4497_v13 = vpack.c.bf16 %v596_v12, %v595_v11  ;;  %v1238_v19 = vld [vmem:[%s5429_s25 + $0x8] sm:$0xff]  ;;  %v1241_v20 = vld [vmem:[%s5429_s25 + $0x20] sm:$0xff]  ;;  %v1240_v25 = vld [vmem:[%s5429_s25 + $0x18] sm:$0xff] }
 0x11e   : > { %4470 = vmatprep.subr.bf16.mxu1 %v4469_v46  ;;  %v1242_v21 = vld [vmem:[%s5429_s25 + $0x28] sm:$0xff]  ;;  %v4549_v22 = vpack.c.bf16 %v1238_v19, %v1237_v18  ;;  %v1243_v26 = vld [vmem:[%s5429_s25 + $0x30] sm:$0xff]  ;;  %v1244_v27 = vld [vmem:[%s5429_s25 + $0x38] sm:$0xff]  ;;  %v4553_v31 = vpack.c.bf16 %v1240_v25, %v1239_v24 }
 0x11f   : > { %4074 = vmatmul.mubr.msk.f32.vlgmr.msra.gmra.mrb[0].mxu0 %vm597_vm1, %v588_v51  ;;  %v4557_v23 = vpack.c.bf16 %v1242_v21, %v1241_v20  ;;  %v1245_v34 = vld [vmem:[%s5429_s25 + $0x40] sm:$0xff]  ;;  %v1246_v35 = vld [vmem:[%s5429_s25 + $0x48] sm:$0xff]  ;;  %v1261_v36 = vld [vmem:[#allocation12] sm:$0xff] }
 0x120   : > { %4093 = vmatmul.mubr.msk.f32.vlgmr.msra.gmra.mrb[0].mxu1 %vm597_vm1, %v588_v51  ;;  %4456 = vmatpush3.bf16.msra.mxu0 %v4453_v45  ;;  %v1249_v37 = vld [vmem:[%s5429_s25 + $0x60] sm:$0xff]  ;;  %v1250_v38 = vld [vmem:[%s5429_s25 + $0x68] sm:$0xff]  ;;  %v4565_v39 = vpack.c.bf16 %v1246_v35, %v1245_v34  ;;  %v1247_v41 = vld [vmem:[%s5429_s25 + $0x50] sm:$0xff] }
 0x121   : > { %4472 = vmatpush3.bf16.msra.mxu1 %v4469_v46  ;;  %4458 = vmatprep.subr.bf16.mxu0 %v4457_v52  ;;  %v4573_v40 = vpack.c.bf16 %v1250_v38, %v1249_v37  ;;  %v1248_v42 = vld [vmem:[%s5429_s25 + $0x58] sm:$0xff]  ;;  %v1251_v43 = vld [vmem:[%s5429_s25 + $0x70] sm:$0xff]  ;;  %v1253_v48 = vld [vmem:[%s5429_s25 + $0x80] sm:$0xff] }
 0x122   : > { %4474 = vmatprep.subr.bf16.mxu1 %v4473_v53  ;;  %4111 = vmatprep.mubr.msk.f32.mxu0 %vm597_vm1, %v587_v33  ;;  %v1252_v44 = vld [vmem:[%s5429_s25 + $0x78] sm:$0xff]  ;;  %v4569_v46 = vpack.c.bf16 %v1248_v42, %v1247_v41  ;;  %v1254_v49 = vld [vmem:[%s5429_s25 + $0x88] sm:$0xff]  ;;  %v1257_v50 = vld [vmem:[%s5429_s25 + $0xa0] sm:$0xff] }
 0x123   : > { %4130 = vmatprep.mubr.msk.f32.mxu1 %vm597_vm1, %v587_v33  ;;  %v4561_v33 = vpack.c.bf16 %v1244_v27, %v1243_v26  ;;  %v1262_v45 = vld [vmem:[#allocation12 + $0x8] sm:$0xff]  ;;  %v4577_v47 = vpack.c.bf16 %v1252_v44, %v1251_v43  ;;  %v1255_v54 = vld [vmem:[%s5429_s25 + $0x90] sm:$0xff]  ;;  %v1263_v60 = vld [vmem:[#allocation13] sm:$0xff] }
 0x124   : > { %4460 = vmatpush3.bf16.msra.mxu0 %v4457_v52  ;;  %v4581_v52 = vpack.c.bf16 %v1254_v49, %v1253_v48  ;;  %v1256_v55 = vld [vmem:[%s5429_s25 + $0x98] sm:$0xff]  ;;  %v1259_v56 = vld [vmem:[%s5429_s25 + $0xb0] sm:$0xff]  ;;  %v1264_v61 = vld [vmem:[#allocation13 + $0x8] sm:$0xff] }
 0x125   : > { %4476 = vmatpush3.bf16.msra.mxu1 %v4473_v53  ;;  %4462 = vmatprep.subr.bf16.mxu0 %v4461_v58  ;;  %v1260_v57 = vld [vmem:[%s5429_s25 + $0xb8] sm:$0xff]  ;;  %v4597_v62 = vpack.c.bf16 %v1264_v61, %v1263_v60  ;;  %v1265_v63 = vld [vmem:[#allocation13 + $0x10] sm:$0xff]  ;;  %v2256_v18 = vld [vmem:[%s5437_s1] sm:$0xff] }
 0x126   : > { %4478 = vmatprep.subr.bf16.mxu1 %v4477_v59  ;;  %v2257_v19 = vld [vmem:[%s5437_s1 + $0x8] sm:$0xff]  ;;  %v2264_v24 = vld [vmem:[%s5821_s28] sm:$0xff]  ;;  %v2258_v25 = vld [vmem:[%s5437_s1 + $0x10] sm:$0xff] }
 0x127   : > { %v2259_v26 = vld [vmem:[%s5437_s1 + $0x18] sm:$0xff]  ;;  %v2265_v27 = vld [vmem:[%s5821_s28 + $0x8] sm:$0xff] }
 0x128   : > { %4464 = vmatpush3.bf16.msra.mxu0 %v4461_v58  ;;  %v4585_v58 = vpack.c.bf16 %v1256_v55, %v1255_v54 }
 0x129   : > { %4480 = vmatpush3.bf16.msra.mxu1 %v4477_v59  ;;  %4466 = vmatprep.subr.bf16.mxu0 %v4465_v0  ;;  %v4593_v59 = vpack.c.bf16 %v1260_v57, %v1259_v56 }
 0x12a   : > { %4482 = vmatprep.subr.bf16.mxu1 %v4481_v1 }
 0x12c   : > { %4468 = vmatpush3.bf16.msra.mxu0 %v4465_v0  ;;  %v1266_v0 = vld [vmem:[#allocation13 + $0x18] sm:$0xff] }
 0x12d   : > { %4484 = vmatpush3.bf16.msra.mxu1 %v4481_v1  ;;  %4486 = vmatprep.subr.bf16.mxu0 %v4485_v4  ;;  %v4601_v1 = vpack.c.bf16 %v1266_v0, %v1265_v63 }
 0x12e   : > { %4502 = vmatprep.subr.bf16.mxu1 %v4485_v4 }
 0x12f   : > { %4112 = vmatmul.mubr.msk.f32.vlgmr.msra.gmra.mrb[2].mxu0 %vm597_vm1, %v588_v51 }
 0x130   : > { %4131 = vmatmul.mubr.msk.f32.vlgmr.msra.gmra.mrb[2].mxu1 %vm597_vm1, %v588_v51  ;;  %4488 = vmatpush3.bf16.msra.mxu0 %v4485_v4  ;;  %v1258_v51 = vld [vmem:[%s5429_s25 + $0xa8] sm:$0xff] }
 0x131   : > { %4504 = vmatpush3.bf16.msra.mxu1 %v4485_v4  ;;  %4490 = vmatprep.subr.bf16.mxu0 %v4489_v7  ;;  %v4589_v53 = vpack.c.bf16 %v1258_v51, %v1257_v50 }
 0x132   : > { %4506 = vmatprep.subr.bf16.mxu1 %v4489_v7 }
 0x134   : > { %4492 = vmatpush3.bf16.msra.mxu0 %v4489_v7 }
 0x135   : > { %4508 = vmatpush3.bf16.msra.mxu1 %v4489_v7  ;;  %4494 = vmatprep.subr.bf16.mxu0 %v4493_v10 }
 0x136   : > { %4510 = vmatprep.subr.bf16.mxu1 %v4493_v10 }
 0x138   : > { %4496 = vmatpush3.bf16.msra.mxu0 %v4493_v10 }
 0x139   : > { %4512 = vmatpush3.bf16.msra.mxu1 %v4493_v10  ;;  %4498 = vmatprep.subr.bf16.mxu0 %v4497_v13 }
 0x13a   : > { %4514 = vmatprep.subr.bf16.mxu1 %v4497_v13 }
 0x13c   : > { %4500 = vmatpush3.bf16.msra.mxu0 %v4497_v13 }
 0x13d   : > { %4516 = vmatpush3.bf16.msra.mxu1 %v4497_v13  ;;  %4518 = vmatprep.subr.bf16.mxu0 %v4485_v4 }
 0x13e   : > { %4534 = vmatprep.subr.bf16.mxu1 %v4485_v4 }
 0x1f2   : > { %v4075_v14 = vpop.f32.mrb[0].mxu0 }
 0x1f3   : > { %v4094_v15 = vpop.f32.mrb[0].mxu1  ;;  %v670_v16 = vpop.f32.mrb[1].mxu0 }
 0x1f4   : > { %v745_v17 = vpop.f32.mrb[1].mxu1  ;;  %4149 = vmatprep.mubr.msk.f32.mxu0 %vm597_vm1, %v670_v16 }
 0x1f5   : > { %4168 = vmatprep.mubr.msk.f32.mxu1 %vm597_vm1, %v745_v17  ;;  %4150 = vmatmul.mubr.msk.f32.vlgmr.msra.gmra.mrb[4].mxu0 %vm597_vm1, %v4075_v14 }
 0x1f6   : > { %4169 = vmatmul.mubr.msk.f32.vlgmr.msra.gmra.mrb[4].mxu1 %vm597_vm1, %v4094_v15  ;;  %4520 = vmatpush3.bf16.msra.mxu0 %v4485_v4 }
 0x1f7   : > { %4536 = vmatpush3.bf16.msra.mxu1 %v4485_v4  ;;  %4522 = vmatprep.subr.bf16.mxu0 %v4489_v7 }
 0x1f8   : > { %4538 = vmatprep.subr.bf16.mxu1 %v4489_v7 }
 0x1fa   : > { %4524 = vmatpush3.bf16.msra.mxu0 %v4489_v7 }
 0x1fb   : > { %4540 = vmatpush3.bf16.msra.mxu1 %v4489_v7  ;;  %4526 = vmatprep.subr.bf16.mxu0 %v4493_v10 }
 0x1fc   : > { %4542 = vmatprep.subr.bf16.mxu1 %v4493_v10 }
 0x1fe   : > { %4528 = vmatpush3.bf16.msra.mxu0 %v4493_v10 }
 0x1ff   : > { %4544 = vmatpush3.bf16.msra.mxu1 %v4493_v10  ;;  %4530 = vmatprep.subr.bf16.mxu0 %v4497_v13 }
 0x200   : > { %4546 = vmatprep.subr.bf16.mxu1 %v4497_v13 }
 0x202   : > { %4532 = vmatpush3.bf16.msra.mxu0 %v4497_v13  ;;  %v4113_v28 = vpop.f32.mrb[2].mxu0 }
 0x203   : > { %4548 = vmatpush3.bf16.msra.mxu1 %v4497_v13  ;;  %v4132_v29 = vpop.f32.mrb[2].mxu1  ;;  %v820_v30 = vpop.f32.mrb[3].mxu0  ;;  %4550 = vmatprep.subr.bf16.mxu0 %v4549_v22 }
 0x204   : > { %v895_v32 = vpop.f32.mrb[3].mxu1  ;;  %4187 = vmatprep.mubr.msk.f32.mxu0 %vm597_vm1, %v820_v30  ;;  %4558 = vmatprep.subr.bf16.mxu1 %v4557_v23  ;;  %v2262_v30 = vld [vmem:[%s5437_s1 + $0x30] sm:$0xff] }
 0x205   : > { %4206 = vmatprep.mubr.msk.f32.mxu1 %vm597_vm1, %v895_v32  ;;  %4188 = vmatmul.mubr.msk.f32.vlgmr.msra.gmra.mrb[6].mxu0 %vm597_vm1, %v4113_v28  ;;  %v2260_v28 = vld [vmem:[%s5437_s1 + $0x20] sm:$0xff] }
 0x206   : > { %4207 = vmatmul.mubr.msk.f32.vlgmr.msra.gmra.mrb[6].mxu1 %vm597_vm1, %v4132_v29  ;;  %4552 = vmatpush3.bf16.msra.mxu0 %v4549_v22  ;;  %v2261_v29 = vld [vmem:[%s5437_s1 + $0x28] sm:$0xff]  ;;  %v5655_v32 = vld [vmem:[%s5822_s21] sm:$0xff] }
 0x207   : > { %4560 = vmatpush3.bf16.msra.mxu1 %v4557_v23  ;;  %4554 = vmatprep.subr.bf16.mxu0 %v4553_v31 }
 0x208   : > { %4562 = vmatprep.subr.bf16.mxu1 %v4561_v33  ;;  %4217 = vmatprep.mubr.msk.f32.mxu0 %vm1267_vm2, %v1261_v36 }
 0x209   : > { %4228 = vmatprep.mubr.msk.f32.mxu1 %vm1267_vm2, %v1261_v36 }
 0x20a   : > { %4556 = vmatpush3.bf16.msra.mxu0 %v4553_v31  ;;  %v2263_v31 = vld [vmem:[%s5437_s1 + $0x38] sm:$0xff] }
 0x20b   : > { %4564 = vmatpush3.bf16.msra.mxu1 %v4561_v33  ;;  %4566 = vmatprep.subr.bf16.mxu0 %v4565_v39 }
 0x20c   : > { %4574 = vmatprep.subr.bf16.mxu1 %v4573_v40 }
 0x20d   : > { %4218 = vmatmul.mubr.msk.f32.vlgmr.msra.gmra.mrb[8].mxu0 %vm1267_vm2, %v1262_v45 }
 0x20e   : > { %4229 = vmatmul.mubr.msk.f32.vlgmr.msra.gmra.mrb[8].mxu1 %vm1267_vm2, %v1262_v45  ;;  %4568 = vmatpush3.bf16.msra.mxu0 %v4565_v39 }
 0x20f   : > { %4576 = vmatpush3.bf16.msra.mxu1 %v4573_v40  ;;  %4570 = vmatprep.subr.bf16.mxu0 %v4569_v46 }
 0x210   : > { %4578 = vmatprep.subr.bf16.mxu1 %v4577_v47  ;;  %4239 = vmatprep.mubr.msk.f32.mxu0 %vm1267_vm2, %v1261_v36 }
 0x211   : > { %4250 = vmatprep.mubr.msk.f32.mxu1 %vm1267_vm2, %v1261_v36 }
 0x212   : > { %4572 = vmatpush3.bf16.msra.mxu0 %v4569_v46 }
 0x213   : > { %4580 = vmatpush3.bf16.msra.mxu1 %v4577_v47  ;;  %4582 = vmatprep.subr.bf16.mxu0 %v4581_v52 }
 0x214   : > { %4590 = vmatprep.subr.bf16.mxu1 %v4589_v53 }
 0x215   : > { %4240 = vmatmul.mubr.msk.f32.vlgmr.msra.gmra.mrb[10].mxu0 %vm1267_vm2, %v1262_v45 }
 0x216   : > { %4251 = vmatmul.mubr.msk.f32.vlgmr.msra.gmra.mrb[10].mxu1 %vm1267_vm2, %v1262_v45  ;;  %4584 = vmatpush3.bf16.msra.mxu0 %v4581_v52 }
 0x217   : > { %4592 = vmatpush3.bf16.msra.mxu1 %v4589_v53  ;;  %4586 = vmatprep.subr.bf16.mxu0 %v4585_v58 }
 0x218   : > { %4594 = vmatprep.subr.bf16.mxu1 %v4593_v59  ;;  %4261 = vmatprep.mubr.msk.f32.mxu0 %vm1267_vm2, %v1261_v36 }
 0x219   : > { %4272 = vmatprep.mubr.msk.f32.mxu1 %vm1267_vm2, %v1261_v36 }
 0x21a   : > { %4588 = vmatpush3.bf16.msra.mxu0 %v4585_v58 }
 0x21b   : > { %4596 = vmatpush3.bf16.msra.mxu1 %v4593_v59  ;;  %4598 = vmatprep.subr.bf16.mxu0 %v4597_v62 }
 0x21c   : > { %4606 = vmatprep.subr.bf16.mxu1 %v4597_v62 }
 0x21d   : > { %4262 = vmatmul.mubr.msk.f32.vlgmr.msra.gmra.mrb[12].mxu0 %vm1267_vm2, %v1262_v45 }
 0x21e   : > { %4273 = vmatmul.mubr.msk.f32.vlgmr.msra.gmra.mrb[12].mxu1 %vm1267_vm2, %v1262_v45  ;;  %4600 = vmatpush3.bf16.msra.mxu0 %v4597_v62 }
 0x21f   : > { %4608 = vmatpush3.bf16.msra.mxu1 %v4597_v62  ;;  %4602 = vmatprep.subr.bf16.mxu0 %v4601_v1 }
 0x220   : > { %4610 = vmatprep.subr.bf16.mxu1 %v4601_v1 }
 0x222   : > { %4604 = vmatpush3.bf16.msra.mxu0 %v4601_v1 }
 0x223   : > { %4612 = vmatpush3.bf16.msra.mxu1 %v4601_v1  ;;  %4614 = vmatprep.subr.bf16.mxu0 %v4597_v62 }
 0x224   : > { %4622 = vmatprep.subr.bf16.mxu1 %v4597_v62 }
 0x2c8   : > { %v4151_v2 = vpop.f32.mrb[4].mxu0 }
 0x2c9   : > { %1230 = vst.msk [vmem:[%s5460_s29 + $0x8] sm:$0xff] %vm1228_vm0, %v4151_v2  ;;  %v4170_v3 = vpop.f32.mrb[4].mxu1  ;;  %v976_v4 = vpop.f32.mrb[5].mxu0 }
 0x2ca   : > { %1232 = vst.msk [vmem:[%s5460_s29 + $0x18] sm:$0xff] %vm1228_vm0, %v4170_v3  ;;  %1229 = vst.msk [vmem:[%s5460_s29] sm:$0xff] %vm1228_vm0, %v976_v4  ;;  %v1057_v5 = vpop.f32.mrb[5].mxu1 }
 0x2cb   : > { %1231 = vst.msk [vmem:[%s5460_s29 + $0x10] sm:$0xff] %vm1228_vm0, %v1057_v5 }
 0x2d8   : > { %v4189_v6 = vpop.f32.mrb[6].mxu0 }
 0x2d9   : > { %1234 = vst.msk [vmem:[%s5460_s29 + $0x28] sm:$0xff] %vm1228_vm0, %v4189_v6  ;;  %v4208_v7 = vpop.f32.mrb[6].mxu1  ;;  %v1138_v8 = vpop.f32.mrb[7].mxu0 }
 0x2da   : > { %1236 = vst.msk [vmem:[%s5460_s29 + $0x38] sm:$0xff] %vm1228_vm0, %v4208_v7  ;;  %1233 = vst.msk [vmem:[%s5460_s29 + $0x20] sm:$0xff] %vm1228_vm0, %v1138_v8  ;;  %v1219_v9 = vpop.f32.mrb[7].mxu1 }
 0x2db   : > { %1235 = vst.msk [vmem:[%s5460_s29 + $0x30] sm:$0xff] %vm1228_vm0, %v1219_v9 }
 0x2e0   : > { %v4219_v10 = vpop.f32.mrb[8].mxu0 }
 0x2e1   : > { %v4230_v11 = vpop.f32.mrb[8].mxu1  ;;  %v1340_v12 = vpop.f32.mrb[9].mxu0 }
 0x2e2   : > { %v1415_v13 = vpop.f32.mrb[9].mxu1  ;;  %4283 = vmatprep.mubr.msk.f32.mxu0 %vm1267_vm2, %v1340_v12 }
 0x2e3   : > { %4294 = vmatprep.mubr.msk.f32.mxu1 %vm1267_vm2, %v1415_v13  ;;  %4284 = vmatmul.mubr.msk.f32.vlgmr.msra.gmra.mrb[14].mxu0 %vm1267_vm2, %v4219_v10 }
 0x2e4   : > { %4295 = vmatmul.mubr.msk.f32.vlgmr.msra.gmra.mrb[14].mxu1 %vm1267_vm2, %v4230_v11  ;;  %4616 = vmatpush3.bf16.msra.mxu0 %v4597_v62 }
 0x2e5   : > { %4624 = vmatpush3.bf16.msra.mxu1 %v4597_v62  ;;  %4618 = vmatprep.subr.bf16.mxu0 %v4601_v1 }
 0x2e6   : > { %4626 = vmatprep.subr.bf16.mxu1 %v4601_v1 }
 0x2e8   : > { %4620 = vmatpush3.bf16.msra.mxu0 %v4601_v1  ;;  %v4241_v14 = vpop.f32.mrb[10].mxu0 }
 0x2e9   : > { %4628 = vmatpush3.bf16.msra.mxu1 %v4601_v1  ;;  %v4252_v15 = vpop.f32.mrb[10].mxu1  ;;  %v1490_v16 = vpop.f32.mrb[11].mxu0  ;;  %4630 = vmatprep.subr.bf16.mxu0 %v4597_v62 }
 0x2ea   : > { %v1565_v17 = vpop.f32.mrb[11].mxu1  ;;  %4305 = vmatprep.mubr.msk.f32.mxu0 %vm1267_vm2, %v1490_v16  ;;  %4638 = vmatprep.subr.bf16.mxu1 %v4597_v62 }
 0x2eb   : > { %4316 = vmatprep.mubr.msk.f32.mxu1 %vm1267_vm2, %v1565_v17  ;;  %4306 = vmatmul.mubr.msk.f32.vlgmr.msra.gmra.mrb[16].mxu0 %vm1267_vm2, %v4241_v14 }
 0x2ec   : > { %4317 = vmatmul.mubr.msk.f32.vlgmr.msra.gmra.mrb[16].mxu1 %vm1267_vm2, %v4252_v15  ;;  %4632 = vmatpush3.bf16.msra.mxu0 %v4597_v62 }
 0x2ed   : > { %4640 = vmatpush3.bf16.msra.mxu1 %v4597_v62  ;;  %4634 = vmatprep.subr.bf16.mxu0 %v4601_v1 }
 0x2ee   : > { %4642 = vmatprep.subr.bf16.mxu1 %v4601_v1 }
 0x2f0   : > { %4636 = vmatpush3.bf16.msra.mxu0 %v4601_v1  ;;  %v4263_v20 = vpop.f32.mrb[12].mxu0 }
 0x2f1   : > { %4644 = vmatpush3.bf16.msra.mxu1 %v4601_v1  ;;  %v4274_v21 = vpop.f32.mrb[12].mxu1  ;;  %v1640_v22 = vpop.f32.mrb[13].mxu0  ;;  %4341 = vmatprep.subr.mxu0 %v2256_v18 }
 0x2f2   : > { %v1715_v23 = vpop.f32.mrb[13].mxu1  ;;  %4327 = vmatprep.mubr.msk.f32.mxu0 %vm1267_vm2, %v1640_v22  ;;  %4346 = vmatprep.subr.mxu1 %v2257_v19 }
 0x2f3   : > { %4338 = vmatprep.mubr.msk.f32.mxu1 %vm1267_vm2, %v1715_v23  ;;  %4328 = vmatmul.mubr.msk.f32.vlgmr.msra.gmra.mrb[18].mxu0 %vm1267_vm2, %v4263_v20 }
 0x2f4   : > { %4339 = vmatmul.mubr.msk.f32.vlgmr.msra.gmra.mrb[18].mxu1 %vm1267_vm2, %v4274_v21  ;;  %4342 = vmatpush3.msra.mxu0 %v2256_v18 }
 0x2f5   : > { %4347 = vmatpush3.msra.mxu1 %v2257_v19  ;;  %4343 = vmatprep.mubr.msk.f32.mxu0 %vm2267_vm3, %v2264_v24 }
 0x2f6   : > { %4348 = vmatprep.mubr.msk.f32.mxu1 %vm2267_vm3, %v2264_v24  ;;  %4351 = vmatprep.subr.mxu0 %v2258_v25 }
 0x2f7   : > { %4356 = vmatprep.subr.mxu1 %v2259_v26  ;;  %4344 = vmatmul.mubr.msk.f32.vlgmr.msra.gmra.mrb[20].mxu0 %vm2267_vm3, %v2265_v27 }
 0x2f8   : > { %4349 = vmatmul.mubr.msk.f32.vlgmr.msra.gmra.mrb[20].mxu1 %vm2267_vm3, %v2265_v27  ;;  %4352 = vmatpush3.msra.mxu0 %v2258_v25 }
 0x2f9   : > { %4357 = vmatpush3.msra.mxu1 %v2259_v26  ;;  %4353 = vmatprep.mubr.msk.f32.mxu0 %vm2267_vm3, %v2264_v24 }
 0x2fa   : > { %4358 = vmatprep.mubr.msk.f32.mxu1 %vm2267_vm3, %v2264_v24  ;;  %4361 = vmatprep.subr.mxu0 %v2260_v28 }
 0x2fb   : > { %4366 = vmatprep.subr.mxu1 %v2261_v29  ;;  %4354 = vmatmul.mubr.msk.f32.vlgmr.msra.gmra.mrb[22].mxu0 %vm2267_vm3, %v2265_v27 }
 0x2fc   : > { %4359 = vmatmul.mubr.msk.f32.vlgmr.msra.gmra.mrb[22].mxu1 %vm2267_vm3, %v2265_v27  ;;  %4362 = vmatpush3.msra.mxu0 %v2260_v28 }
 0x2fd   : > { %4367 = vmatpush3.msra.mxu1 %v2261_v29  ;;  %4363 = vmatprep.mubr.msk.f32.mxu0 %vm2267_vm3, %v2264_v24 }
 0x2fe   : > { %4368 = vmatprep.mubr.msk.f32.mxu1 %vm2267_vm3, %v2264_v24  ;;  %4371 = vmatprep.subr.mxu0 %v2262_v30 }
 0x2ff   : > { %4376 = vmatprep.subr.mxu1 %v2263_v31  ;;  %4364 = vmatmul.mubr.msk.f32.vlgmr.msra.gmra.mrb[24].mxu0 %vm2267_vm3, %v2265_v27 }
 0x300   : > { %4369 = vmatmul.mubr.msk.f32.vlgmr.msra.gmra.mrb[24].mxu1 %vm2267_vm3, %v2265_v27  ;;  %4372 = vmatpush3.msra.mxu0 %v2262_v30 }
 0x301   : > { %4377 = vmatpush3.msra.mxu1 %v2263_v31  ;;  %4373 = vmatprep.mubr.msk.f32.mxu0 %vm2267_vm3, %v2264_v24 }
 0x302   : > { %4378 = vmatprep.mubr.msk.f32.mxu1 %vm2267_vm3, %v2264_v24  ;;  %4381 = vmatprep.subr.mxu0 %v5655_v32 }
 0x303   : > { %4374 = vmatmul.mubr.msk.f32.vlgmr.msra.gmra.mrb[26].mxu0 %vm2267_vm3, %v2265_v27  ;;  %4386 = vmatprep.subr.mxu1 %v5655_v32 }
 0x304   : > { %4379 = vmatmul.mubr.msk.f32.vlgmr.msra.gmra.mrb[26].mxu1 %vm2267_vm3, %v2265_v27  ;;  %4382 = vmatpush3.msra.mxu0 %v5655_v32 }
 0x305   : > { %4387 = vmatpush3.msra.mxu1 %v5655_v32  ;;  %4391 = vmatprep.subr.mxu0 %v5655_v32 }
 0x306   : > { %4396 = vmatprep.subr.mxu1 %v5655_v32 }
 0x3b6   : > { %v4285_v33 = vpop.f32.mrb[14].mxu0 }
 0x3b7   : > { %3777 = vst.msk [vmem:[%s5460_s29 + $0x48] sm:$0xff] %vm1228_vm0, %v4285_v33  ;;  %v4296_v34 = vpop.f32.mrb[14].mxu1  ;;  %v1796_v35 = vpop.f32.mrb[15].mxu0 }
 0x3b8   : > { %3779 = vst.msk [vmem:[%s5460_s29 + $0x58] sm:$0xff] %vm1228_vm0, %v4296_v34  ;;  %3776 = vst.msk [vmem:[%s5460_s29 + $0x40] sm:$0xff] %vm1228_vm0, %v1796_v35  ;;  %v1877_v36 = vpop.f32.mrb[15].mxu1 }
 0x3b9   : > { %3778 = vst.msk [vmem:[%s5460_s29 + $0x50] sm:$0xff] %vm1228_vm0, %v1877_v36 }
 0x3be   : > { %v4307_v37 = vpop.f32.mrb[16].mxu0 }
 0x3bf   : > { %3781 = vst.msk [vmem:[%s5460_s29 + $0x68] sm:$0xff] %vm1228_vm0, %v4307_v37  ;;  %v4318_v38 = vpop.f32.mrb[16].mxu1  ;;  %v1958_v39 = vpop.f32.mrb[17].mxu0 }
 0x3c0   : > { %3783 = vst.msk [vmem:[%s5460_s29 + $0x78] sm:$0xff] %vm1228_vm0, %v4318_v38  ;;  %3780 = vst.msk [vmem:[%s5460_s29 + $0x60] sm:$0xff] %vm1228_vm0, %v1958_v39  ;;  %v2039_v40 = vpop.f32.mrb[17].mxu1 }
 0x3c1   : > { %3782 = vst.msk [vmem:[%s5460_s29 + $0x70] sm:$0xff] %vm1228_vm0, %v2039_v40 }
 0x3c6   : > { %v4329_v41 = vpop.f32.mrb[18].mxu0 }
 0x3c7   : > { %3785 = vst.msk [vmem:[%s5460_s29 + $0x88] sm:$0xff] %vm1228_vm0, %v4329_v41  ;;  %v4340_v42 = vpop.f32.mrb[18].mxu1  ;;  %v2120_v43 = vpop.f32.mrb[19].mxu0 }
 0x3c8   : > { %3787 = vst.msk [vmem:[%s5460_s29 + $0x98] sm:$0xff] %vm1228_vm0, %v4340_v42  ;;  %3784 = vst.msk [vmem:[%s5460_s29 + $0x80] sm:$0xff] %vm1228_vm0, %v2120_v43  ;;  %v2201_v44 = vpop.f32.mrb[19].mxu1 }
 0x3c9   : > { %3786 = vst.msk [vmem:[%s5460_s29 + $0x90] sm:$0xff] %vm1228_vm0, %v2201_v44 }
 0x3ca   : > { %v4345_v45 = vpop.f32.mrb[20].mxu0 }
 0x3cb   : > { %v4350_v46 = vpop.f32.mrb[20].mxu1  ;;  %v2340_v47 = vpop.f32.mrb[21].mxu0 }
 0x3cc   : > { %v2415_v48 = vpop.f32.mrb[21].mxu1  ;;  %4383 = vmatprep.mubr.msk.f32.mxu0 %vm2267_vm3, %v2340_v47 }
 0x3cd   : > { %4388 = vmatprep.mubr.msk.f32.mxu1 %vm2267_vm3, %v2415_v48  ;;  %4384 = vmatmul.mubr.msk.f32.vlgmr.msra.gmra.mrb[28].mxu0 %vm2267_vm3, %v4345_v45 }
 0x3ce   : > { %4389 = vmatmul.mubr.msk.f32.vlgmr.msra.gmra.mrb[28].mxu1 %vm2267_vm3, %v4350_v46  ;;  %4392 = vmatpush3.msra.mxu0 %v5655_v32  ;;  %v4355_v49 = vpop.f32.mrb[22].mxu0 }
 0x3cf   : > { %4397 = vmatpush3.msra.mxu1 %v5655_v32  ;;  %v4360_v50 = vpop.f32.mrb[22].mxu1  ;;  %v2490_v51 = vpop.f32.mrb[23].mxu0  ;;  %4401 = vmatprep.subr.mxu0 %v5655_v32 }
 0x3d0   : > { %v2565_v52 = vpop.f32.mrb[23].mxu1  ;;  %4393 = vmatprep.mubr.msk.f32.mxu0 %vm2267_vm3, %v2490_v51  ;;  %4406 = vmatprep.subr.mxu1 %v5655_v32 }
 0x3d1   : > { %4398 = vmatprep.mubr.msk.f32.mxu1 %vm2267_vm3, %v2565_v52  ;;  %4394 = vmatmul.mubr.msk.f32.vlgmr.msra.gmra.mrb[30].mxu0 %vm2267_vm3, %v4355_v49 }
 0x3d2   : > { %4399 = vmatmul.mubr.msk.f32.vlgmr.msra.gmra.mrb[30].mxu1 %vm2267_vm3, %v4360_v50  ;;  %4402 = vmatpush3.msra.mxu0 %v5655_v32  ;;  %v4365_v53 = vpop.f32.mrb[24].mxu0 }
 0x3d3   : > { %4407 = vmatpush3.msra.mxu1 %v5655_v32  ;;  %v4370_v54 = vpop.f32.mrb[24].mxu1  ;;  %v2640_v55 = vpop.f32.mrb[25].mxu0  ;;  %4411 = vmatprep.subr.mxu0 %v5655_v32 }
 0x3d4   : > { %v2715_v56 = vpop.f32.mrb[25].mxu1  ;;  %4403 = vmatprep.mubr.msk.f32.mxu0 %vm2267_vm3, %v2640_v55  ;;  %4416 = vmatprep.subr.mxu1 %v5655_v32 }
 0x3d5   : > { %4408 = vmatprep.mubr.msk.f32.mxu1 %vm2267_vm3, %v2715_v56  ;;  %4404 = vmatmul.mubr.msk.f32.vlgmr.msra.gmra.mrb[32].mxu0 %vm2267_vm3, %v4365_v53 }
 0x3d6   : > { %4409 = vmatmul.mubr.msk.f32.vlgmr.msra.gmra.mrb[32].mxu1 %vm2267_vm3, %v4370_v54  ;;  %4412 = vmatpush3.msra.mxu0 %v5655_v32  ;;  %v4375_v57 = vpop.f32.mrb[26].mxu0 }
 0x3d7   : > { %4417 = vmatpush3.msra.mxu1 %v5655_v32  ;;  %v4380_v58 = vpop.f32.mrb[26].mxu1  ;;  %v2790_v59 = vpop.f32.mrb[27].mxu0 }
 0x3d8   : > { %v2865_v60 = vpop.f32.mrb[27].mxu1  ;;  %4413 = vmatprep.mubr.msk.f32.mxu0 %vm2267_vm3, %v2790_v59 }
 0x3d9   : > { %4418 = vmatprep.mubr.msk.f32.mxu1 %vm2267_vm3, %v2865_v60  ;;  %4414 = vmatmul.mubr.msk.f32.vlgmr.msra.gmra.mrb[34].mxu0 %vm2267_vm3, %v4375_v57 }
 0x3da   : > { %4419 = vmatmul.mubr.msk.f32.vlgmr.msra.gmra.mrb[34].mxu1 %vm2267_vm3, %v4380_v58 }
 0x4a0   : > { %v4385_v61 = vpop.f32.mrb[28].mxu0 }
 0x4a1   : > { %3837 = vst.msk [vmem:[%s5460_s29 + $0x128] sm:$0xff] %vm1228_vm0, %v4385_v61  ;;  %v4390_v62 = vpop.f32.mrb[28].mxu1  ;;  %v2946_v63 = vpop.f32.mrb[29].mxu0 }
 0x4a2   : > { %3839 = vst.msk [vmem:[%s5460_s29 + $0x138] sm:$0xff] %vm1228_vm0, %v4390_v62  ;;  %3836 = vst.msk [vmem:[%s5460_s29 + $0x120] sm:$0xff] %vm1228_vm0, %v2946_v63  ;;  %v3027_v0 = vpop.f32.mrb[29].mxu1 }
 0x4a3   : > { %3838 = vst.msk [vmem:[%s5460_s29 + $0x130] sm:$0xff] %vm1228_vm0, %v3027_v0 }
 0x4a4   : > { %v4395_v1 = vpop.f32.mrb[30].mxu0 }
 0x4a5   : > { %3841 = vst.msk [vmem:[%s5460_s29 + $0x148] sm:$0xff] %vm1228_vm0, %v4395_v1  ;;  %v4400_v2 = vpop.f32.mrb[30].mxu1  ;;  %v3108_v3 = vpop.f32.mrb[31].mxu0 }
 0x4a6   : > { %3843 = vst.msk [vmem:[%s5460_s29 + $0x158] sm:$0xff] %vm1228_vm0, %v4400_v2  ;;  %3840 = vst.msk [vmem:[%s5460_s29 + $0x140] sm:$0xff] %vm1228_vm0, %v3108_v3  ;;  %v3189_v4 = vpop.f32.mrb[31].mxu1 }
 0x4a7   : > { %3842 = vst.msk [vmem:[%s5460_s29 + $0x150] sm:$0xff] %vm1228_vm0, %v3189_v4 }
 0x4a8   : > { %v4405_v5 = vpop.f32.mrb[32].mxu0 }
 0x4a9   : > { %3845 = vst.msk [vmem:[%s5460_s29 + $0x168] sm:$0xff] %vm1228_vm0, %v4405_v5  ;;  %v4410_v6 = vpop.f32.mrb[32].mxu1  ;;  %v3270_v7 = vpop.f32.mrb[33].mxu0 }
 0x4aa   : > { %3847 = vst.msk [vmem:[%s5460_s29 + $0x178] sm:$0xff] %vm1228_vm0, %v4410_v6  ;;  %3844 = vst.msk [vmem:[%s5460_s29 + $0x160] sm:$0xff] %vm1228_vm0, %v3270_v7  ;;  %v3351_v8 = vpop.f32.mrb[33].mxu1 }
 0x4ab   : > { %3846 = vst.msk [vmem:[%s5460_s29 + $0x170] sm:$0xff] %vm1228_vm0, %v3351_v8 }
 0x4ac   : > { %v4415_v9 = vpop.f32.mrb[34].mxu0 }
 0x4ad   : > { %3849 = vst.msk [vmem:[%s5460_s29 + $0x188] sm:$0xff] %vm1228_vm0, %v4415_v9  ;;  %v4420_v10 = vpop.f32.mrb[34].mxu1  ;;  %v3432_v11 = vpop.f32.mrb[35].mxu0 }
 0x4ae   : > { %3851 = vst.msk [vmem:[%s5460_s29 + $0x198] sm:$0xff] %vm1228_vm0, %v4420_v10  ;;  %3848 = vst.msk [vmem:[%s5460_s29 + $0x180] sm:$0xff] %vm1228_vm0, %v3432_v11  ;;  %v3513_v12 = vpop.f32.mrb[35].mxu1 }
 0x4af   : > { %3850 = vst.msk [vmem:[%s5460_s29 + $0x190] sm:$0xff] %vm1228_vm0, %v3513_v12 }
 0x4b0 PF: > { %s5823_s16 = sld [smem:[#allocation22_spill]]  ;;  %s5824_s20 = sld [smem:[#allocation21_spill]] }
 0x4b1   : > { %s5825_s15 = sld [smem:[#allocation23_spill]]  ;;  %s5826_s13 = smov %s5024_s14 }
 0x4b6   : > { %p28_p10 = scmp.ge.s32.totalorder %s5823_s16, 4   ;;  %s5827_s14 = smov %s5824_s20 }
 0x4b8   :  { %30 = sbr.rel (!%p28_p10) target bundleno = 15 (0xf), region = 156 }
 0x4bf   :  { %3560 = vsyncpa [#allocation3], 1 }
 0x4c0   :  { %3562 = vsyncpa [#allocation3 + $0x1], 1 }
 0x4c1   :  { %3563 = vsyncpa [#allocation5], 1 }
 0x4c2   :  { %3565 = vsyncpa [#allocation5 + $0x1], 1 }
 0x4c3   :  { %3566 = vsyncpa [#allocation8], 1 }
 0x4c4   :  { %3568 = vsyncpa [#allocation8 + $0x1], 1 }
 0x4c5   :  { %3569 = vsyncpa [#allocation11], 1 }
 0x4c6   :  { %3570 = vsyncpa [#allocation14], 1 }

</bundles_post_ra>
